<compile_context>
chip_gen: v5e
topology: v5e:2x2
jax: 0.10.0
libtpu: 0.0.40
codegen_flags: <defaults>
</compile_context>

<pallas_src>
import jax
import jax.numpy as jnp
from jax import lax
from jax.experimental import pallas as pl
from jax.experimental.pallas import tpu as pltpu


def _round_up(x, m):
    return (x + m - 1) // m * m


def _pad2d(x, rows, cols):
    r, c = x.shape
    return jnp.pad(x, ((0, rows - r), (0, cols - c)))


# ---------------------------------------------------------------------------
# Fused kernel: per-source transform + weighted aggregation + output transform
# ---------------------------------------------------------------------------
def _fused_kernel(a_ref, hsrc_ref, hdst_ref, qwT_ref, qb_ref,
                  w1T_ref, w2T_ref, wb_ref, out_ref, n_acc, ws_acc):
    k = pl.program_id(1)

    @pl.when(k == 0)
    def _init():
        n_acc[...] = jnp.zeros_like(n_acc)
        ws_acc[...] = jnp.zeros_like(ws_acc)

    a = a_ref[...]                                              # (TM, TK)

    # n_src tile = relu(h_src_tile @ Q^T + q_b), recomputed per K step
    # (cheap: ratio to the aggregation matmul is D/tile_m <= 1).
    nsrc = jnp.dot(hsrc_ref[...], qwT_ref[...],
                   preferred_element_type=jnp.float32)
    nsrc = jnp.maximum(nsrc + qb_ref[...], 0.0)

    # n[v] += sum_u A[v,u] * n_src[u]   (fn.u_mul_e + fn.sum on the MXU)
    n_acc[...] += jnp.dot(a, nsrc.astype(a.dtype),
                          preferred_element_type=jnp.float32)
    # ws[v] += sum_u A[v,u]             (fn.copy_e + fn.sum, XLU reduce)
    ws_acc[...] += jnp.sum(a.astype(jnp.float32), axis=1, keepdims=True)

    @pl.when(k == pl.num_programs(1) - 1)
    def _finalize():
        ws = jnp.maximum(ws_acc[...], 1.0)                      # clamp(min=1)
        u = n_acc[...] * pl.reciprocal(ws, approx=True)         # EUP
        # z = relu(W @ concat([n/ws, h_dst]) + b); W split -> no concat.
        z = jnp.dot(u.astype(w1T_ref.dtype), w1T_ref[...],
                    preferred_element_type=jnp.float32)
        z = z + jnp.dot(hdst_ref[...], w2T_ref[...],
                        preferred_element_type=jnp.float32)
        z = jnp.maximum(z + wb_ref[...], 0.0)
        # l2 normalize with the (norm == 0) -> 1 guard (guard on ss: rsqrt(0)=inf)
        ss = jnp.sum(z * z, axis=1, keepdims=True)
        inv = jnp.where(ss == 0.0, 1.0, lax.rsqrt(ss))          # EUP
        out_ref[...] = (z * inv).astype(out_ref.dtype)


def ui_embd_forward(h_src, h_dst, src, dst, weights,
                    q_w, q_b, w_w, w_b, *,
                    tile_m=256, tile_k=256,
                    compute_dtype=jnp.bfloat16, out_dtype=jnp.float32):
    """h_src: (Ns, D); h_dst: (Nd, D); src/dst: (E,) int32; weights: (E,) f32.
    q_w: (D, D), q_b: (D,), w_w: (D, 2D), w_b: (D,).  Returns (Nd, D) out_dtype.
    tile_m / tile_k: dst / src row tiles (use 128 on v5e, 256 on v6e/v7x)."""
    Ns, D = h_src.shape
    Nd, _ = h_dst.shape

    D_p = _round_up(D, 128)          # lane-dense feature dim
    Ns_p = _round_up(Ns, tile_k)
    Nd_p = _round_up(Nd, tile_m)

    # Dense weighted adjacency A[v, u] = sum of edge weights u -> v; both
    # dgl update_all reductions become operations on A inside the kernel.
    # TODO(synk): for sparse sampled blocks (fan-in << Ns) a scalar-prefetch
    # gather formulation avoids materializing this O(Nd*Ns) adjacency.
    adj = jnp.zeros((Nd_p, Ns_p), jnp.float32).at[
        dst.astype(jnp.int32), src.astype(jnp.int32)
    ].add(weights.astype(jnp.float32))

    a = adj.astype(compute_dtype)
    hs = _pad2d(h_src.astype(jnp.float32), Ns_p, D_p).astype(compute_dtype)
    hd = _pad2d(h_dst.astype(jnp.float32), Nd_p, D_p).astype(compute_dtype)

    q_wT = _pad2d(q_w.T.astype(jnp.float32), D_p, D_p).astype(compute_dtype)
    w1_T = _pad2d(w_w[:, :D].T.astype(jnp.float32), D_p, D_p).astype(compute_dtype)
    w2_T = _pad2d(w_w[:, D:].T.astype(jnp.float32), D_p, D_p).astype(compute_dtype)
    q_b2 = _pad2d(q_b.reshape(1, D).astype(jnp.float32), 1, D_p)   # f32 bias
    w_b2 = _pad2d(w_b.reshape(1, D).astype(jnp.float32), 1, D_p)   # f32 bias

    grid = (Nd_p // tile_m, Ns_p // tile_k)

    nbytes = jnp.dtype(compute_dtype).itemsize
    flops = (2 * Nd_p * Ns_p * D_p                       # A @ n_src
             + 2 * Ns_p * D_p * D_p * grid[0]            # Q recompute per dst tile
             + 4 * Nd_p * D_p * D_p                      # W1 / W2
             + 10 * Nd_p * D_p)                          # elementwise
    bytes_acc = (Nd_p * Ns_p * nbytes                    # adjacency stream
                 + Ns_p * D_p * nbytes * grid[0]         # h_src re-read per dst tile
                 + Nd_p * D_p * nbytes                   # h_dst
                 + 3 * D_p * D_p * nbytes + 2 * 4 * D_p  # weights + biases
                 + Nd_p * D_p * jnp.dtype(out_dtype).itemsize)

    out = pl.pallas_call(
        _fused_kernel,
        out_shape=jax.ShapeDtypeStruct((Nd_p, D_p), out_dtype),
        grid_spec=pltpu.PrefetchScalarGridSpec(
            num_scalar_prefetch=0,
            grid=grid,
            in_specs=[
                pl.BlockSpec((tile_m, tile_k), lambda i, k: (i, k)),  # A tile
                pl.BlockSpec((tile_k, D_p), lambda i, k: (k, 0)),     # h_src tile
                pl.BlockSpec((tile_m, D_p), lambda i, k: (i, 0)),     # h_dst tile
                pl.BlockSpec((D_p, D_p), lambda i, k: (0, 0)),        # Q^T (resident)
                pl.BlockSpec((1, D_p), lambda i, k: (0, 0)),          # Q bias
                pl.BlockSpec((D_p, D_p), lambda i, k: (0, 0)),        # W1^T (resident)
                pl.BlockSpec((D_p, D_p), lambda i, k: (0, 0)),        # W2^T (resident)
                pl.BlockSpec((1, D_p), lambda i, k: (0, 0)),          # W bias
            ],
            out_specs=pl.BlockSpec((tile_m, D_p), lambda i, k: (i, 0)),
            scratch_shapes=[pltpu.VMEM((tile_m, D_p), jnp.float32),   # n accumulator
                            pltpu.VMEM((tile_m, 1), jnp.float32)],    # ws accumulator
        ),
        compiler_params=pltpu.CompilerParams(
            dimension_semantics=("parallel", "arbitrary"),
            vmem_limit_bytes=48 * 1024 * 1024),
        cost_estimate=pl.CostEstimate(
            flops=int(flops), transcendentals=int(2 * Nd_p),
            bytes_accessed=int(bytes_acc)),
    )(a, hs, hd, q_wT, q_b2, w1_T, w2_T, w_b2)

    return out[:Nd, :D]


# ---------------------------------------------------------------------------
# Pure-JAX reference (edge-level formulation, matches the PyTorch forward)
# ---------------------------------------------------------------------------
def _reference(h_src, h_dst, src, dst, weights, q_w, q_b, w_w, w_b):
    hi = jax.lax.Precision.HIGHEST
    Nd, D = h_dst.shape
    n_src = jax.nn.relu(jnp.dot(h_src, q_w.T, precision=hi) + q_b)
    msg = n_src[src] * weights[:, None]
    n = jnp.zeros((Nd, D), jnp.float32).at[dst].add(msg)
    ws = jnp.zeros((Nd,), jnp.float32).at[dst].add(weights)
    ws = jnp.maximum(ws, 1.0)[:, None]
    z_in = jnp.concatenate([n / ws, h_dst], axis=1)
    z = jax.nn.relu(jnp.dot(z_in, w_w.T, precision=hi) + w_b)
    z_norm = jnp.sqrt(jnp.sum(z * z, axis=1, keepdims=True))
    z_norm = jnp.where(z_norm == 0.0, 1.0, z_norm)
    return z / z_norm


if __name__ == "__main__":
    key = jax.random.PRNGKey(0)
    ks = jax.random.split(key, 8)

    # Small bipartite block; deliberately not multiples of the tile sizes /
    # 128 lanes so the wrapper's padding path is exercised.
    Ns, Nd, D, E = 240, 200, 96, 1536

    h_src = jax.random.normal(ks[0], (Ns, D), dtype=jnp.float32)
    h_dst = jax.random.normal(ks[1], (Nd, D), dtype=jnp.float32)
    src = jax.random.randint(ks[2], (E,), 0, Ns, dtype=jnp.int32)
    dst = jax.random.randint(ks[3], (E,), 0, Nd, dtype=jnp.int32)
    weights = jax.random.uniform(ks[4], (E,), jnp.float32, 0.5, 1.5)

    # Q : Linear(D, D)  — xavier-uniform weight, small random bias
    lim_q = (6.0 / (D + D)) ** 0.5
    q_w = jax.random.uniform(ks[5], (D, D), jnp.float32, -lim_q, lim_q)
    q_b = 0.05 * jax.random.normal(ks[6], (D,), dtype=jnp.float32)
    # W : Linear(2D, D) — xavier-uniform weight, zero bias (reset_parameters)
    lim_w = (6.0 / (3 * D)) ** 0.5
    w_w = jax.random.uniform(ks[7], (D, 2 * D), jnp.float32, -lim_w, lim_w)
    w_b = jnp.zeros((D,), jnp.float32)

    out = ui_embd_forward(h_src, h_dst, src, dst, weights,
                          q_w, q_b, w_w, w_b,
                          tile_m=128, tile_k=128)      # 128 tiles -> 2x2 grid here
    out = jax.block_until_ready(out)

    ref = _reference(h_src, h_dst, src, dst, weights, q_w, q_b, w_w, w_b)
    assert out.shape == (Nd, D)
    err = float(jnp.max(jnp.abs(out - ref)))
    # bf16 matmul operands (f32 accumulate) vs f32-HIGHEST reference -> relaxed tol.
    assert err < 2e-2, err

    print("KERNEL_OK")
</pallas_src>

<mosaic_0001>
module attributes {stable_mosaic.version = 11 : i64} {
  func.func @_fused_kernel(%arg0: i32, %arg1: i32, %arg2: memref<128x128xbf16, #tpu.memory_space<vmem>>, %arg3: memref<128x128xbf16, #tpu.memory_space<vmem>>, %arg4: memref<128x128xbf16, #tpu.memory_space<vmem>>, %arg5: memref<128x128xbf16, #tpu.memory_space<vmem>>, %arg6: memref<1x128xf32, #tpu.memory_space<vmem>>, %arg7: memref<128x128xbf16, #tpu.memory_space<vmem>>, %arg8: memref<128x128xbf16, #tpu.memory_space<vmem>>, %arg9: memref<1x128xf32, #tpu.memory_space<vmem>>, %arg10: memref<128x128xf32, #tpu.memory_space<vmem>>, %arg11: memref<128x128xf32, #tpu.memory_space<vmem>>, %arg12: memref<128x1xf32, #tpu.memory_space<vmem>>) attributes {dimension_semantics = [#tpu.dimension_semantics<parallel>, #tpu.dimension_semantics<arbitrary>], iteration_bounds = array<i64: 2, 2>, scalar_prefetch = 0 : i64, scratch_operands = 2 : i64, tpu.core_type = #tpu.core_type<tc>, window_params = [{transform_indices = @transform_0, window_bounds = array<i64: 128, 128>}, {transform_indices = @transform_1, window_bounds = array<i64: 128, 128>}, {transform_indices = @transform_2, window_bounds = array<i64: 128, 128>}, {pipeline_mode = #tpu.pipeline_mode<synchronous>, transform_indices = @transform_3, window_bounds = array<i64: 128, 128>}, {pipeline_mode = #tpu.pipeline_mode<synchronous>, transform_indices = @transform_4, window_bounds = array<i64: 1, 128>}, {pipeline_mode = #tpu.pipeline_mode<synchronous>, transform_indices = @transform_5, window_bounds = array<i64: 128, 128>}, {pipeline_mode = #tpu.pipeline_mode<synchronous>, transform_indices = @transform_6, window_bounds = array<i64: 128, 128>}, {pipeline_mode = #tpu.pipeline_mode<synchronous>, transform_indices = @transform_7, window_bounds = array<i64: 1, 128>}, {transform_indices = @transform_8, window_bounds = array<i64: 128, 128>}]} {
    %c0_i32 = arith.constant 0 : i32
    %0 = arith.cmpi eq, %arg1, %c0_i32 : i32
    %1 = arith.extui %0 : i1 to i32
    %c0_i32_0 = arith.constant 0 : i32
    %2 = arith.cmpi ne, %1, %c0_i32_0 : i32
    scf.if %2 {
      %cst_20 = arith.constant 0.000000e+00 : f32
      %26 = vector.broadcast %cst_20 : f32 to vector<128x128xf32>
      %c0_21 = arith.constant 0 : index
      %c0_22 = arith.constant 0 : index
      %27 = vector.load %arg11[%c0_21, %c0_22] : memref<128x128xf32, #tpu.memory_space<vmem>>, vector<128x128xf32>
      tpu.vector_store %arg11[%c0_21, %c0_22], %26 {strides = array<i32>} : memref<128x128xf32, #tpu.memory_space<vmem>>, vector<128x128xf32>,
      %cst_23 = arith.constant 0.000000e+00 : f32
      %28 = vector.broadcast %cst_23 : f32 to vector<128x1xf32>
      %c0_24 = arith.constant 0 : index
      %c0_25 = arith.constant 0 : index
      %29 = vector.load %arg12[%c0_24, %c0_25] : memref<128x1xf32, #tpu.memory_space<vmem>>, vector<128x1xf32>
      tpu.vector_store %arg12[%c0_24, %c0_25], %28 {strides = array<i32>} : memref<128x1xf32, #tpu.memory_space<vmem>>, vector<128x1xf32>,
    } else {
    }
    %c0 = arith.constant 0 : index
    %c0_1 = arith.constant 0 : index
    %3 = vector.load %arg2[%c0, %c0_1] : memref<128x128xbf16, #tpu.memory_space<vmem>>, vector<128x128xbf16>
    %c0_2 = arith.constant 0 : index
    %c0_3 = arith.constant 0 : index
    %4 = vector.load %arg3[%c0_2, %c0_3] : memref<128x128xbf16, #tpu.memory_space<vmem>>, vector<128x128xbf16>
    %c0_4 = arith.constant 0 : index
    %c0_5 = arith.constant 0 : index
    %5 = vector.load %arg5[%c0_4, %c0_5] : memref<128x128xbf16, #tpu.memory_space<vmem>>, vector<128x128xbf16>
    %cst = arith.constant dense<0.000000e+00> : vector<128x128xf32>
    %6 = tpu.matmul %4, %5, %cst {dimension_numbers = #tpu.dot_dimension_numbers<[1], [0], [0], [1], [0, 0, 1, 1], [], []>} : vector<128x128xbf16>, vector<128x128xbf16>, vector<128x128xf32> -> vector<128x128xf32>
    %c0_6 = arith.constant 0 : index
    %c0_7 = arith.constant 0 : index
    %7 = vector.load %arg6[%c0_6, %c0_7] : memref<1x128xf32, #tpu.memory_space<vmem>>, vector<1x128xf32>
    %8 = vector.broadcast %7 : vector<1x128xf32> to vector<128x128xf32>
    %9 = arith.addf %6, %8 : vector<128x128xf32>
    %cst_8 = arith.constant 0.000000e+00 : f32
    %10 = vector.broadcast %cst_8 : f32 to vector<128x128xf32>
    %11 = arith.maximumf %9, %10 : vector<128x128xf32>
    %c0_9 = arith.constant 0 : index
    %c0_10 = arith.constant 0 : index
    %12 = vector.load %arg11[%c0_9, %c0_10] : memref<128x128xf32, #tpu.memory_space<vmem>>, vector<128x128xf32>
    %13 = arith.truncf %11 : vector<128x128xf32> to vector<128x128xbf16>
    %cst_11 = arith.constant dense<0.000000e+00> : vector<128x128xf32>
    %14 = tpu.matmul %3, %13, %cst_11 {dimension_numbers = #tpu.dot_dimension_numbers<[1], [0], [0], [1], [0, 0, 1, 1], [], []>} : vector<128x128xbf16>, vector<128x128xbf16>, vector<128x128xf32> -> vector<128x128xf32>
    %15 = arith.addf %12, %14 : vector<128x128xf32>
    %c0_12 = arith.constant 0 : index
    %c0_13 = arith.constant 0 : index
    %16 = vector.load %arg11[%c0_12, %c0_13] : memref<128x128xf32, #tpu.memory_space<vmem>>, vector<128x128xf32>
    tpu.vector_store %arg11[%c0_12, %c0_13], %15 {strides = array<i32>} : memref<128x128xf32, #tpu.memory_space<vmem>>, vector<128x128xf32>,
    %c0_14 = arith.constant 0 : index
    %c0_15 = arith.constant 0 : index
    %17 = vector.load %arg12[%c0_14, %c0_15] : memref<128x1xf32, #tpu.memory_space<vmem>>, vector<128x1xf32>
    %18 = arith.extf %3 : vector<128x128xbf16> to vector<128x128xf32>
    %cst_16 = arith.constant dense<0.000000e+00> : vector<128xf32>
    %19 = vector.multi_reduction <add>, %18, %cst_16 [1] : vector<128x128xf32> to vector<128xf32>
    %20 = vector.shape_cast %19 : vector<128xf32> to vector<128x1xf32>
    %21 = arith.addf %17, %20 : vector<128x1xf32>
    %c0_17 = arith.constant 0 : index
    %c0_18 = arith.constant 0 : index
    %22 = vector.load %arg12[%c0_17, %c0_18] : memref<128x1xf32, #tpu.memory_space<vmem>>, vector<128x1xf32>
    tpu.vector_store %arg12[%c0_17, %c0_18], %21 {strides = array<i32>} : memref<128x1xf32, #tpu.memory_space<vmem>>, vector<128x1xf32>,
    %c1_i32 = arith.constant 1 : i32
    %23 = arith.cmpi eq, %arg1, %c1_i32 : i32
    %24 = arith.extui %23 : i1 to i32
    %c0_i32_19 = arith.constant 0 : i32
    %25 = arith.cmpi ne, %24, %c0_i32_19 : i32
    scf.if %25 {
      %c0_20 = arith.constant 0 : index
      %c0_21 = arith.constant 0 : index
      %26 = vector.load %arg12[%c0_20, %c0_21] : memref<128x1xf32, #tpu.memory_space<vmem>>, vector<128x1xf32>
      %cst_22 = arith.constant 1.000000e+00 : f32
      %27 = vector.broadcast %cst_22 : f32 to vector<128x1xf32>
      %28 = arith.maximumf %26, %27 : vector<128x1xf32>
      %c0_23 = arith.constant 0 : index
      %c0_24 = arith.constant 0 : index
      %29 = vector.load %arg11[%c0_23, %c0_24] : memref<128x128xf32, #tpu.memory_space<vmem>>, vector<128x128xf32>
      %30 = tpu.reciprocal %28 {approx = true} : vector<128x1xf32> -> vector<128x1xf32>
      %31 = vector.broadcast %30 : vector<128x1xf32> to vector<128x128xf32>
      %32 = arith.mulf %29, %31 : vector<128x128xf32>
      %33 = arith.truncf %32 : vector<128x128xf32> to vector<128x128xbf16>
      %c0_25 = arith.constant 0 : index
      %c0_26 = arith.constant 0 : index
      %34 = vector.load %arg7[%c0_25, %c0_26] : memref<128x128xbf16, #tpu.memory_space<vmem>>, vector<128x128xbf16>
      %cst_27 = arith.constant dense<0.000000e+00> : vector<128x128xf32>
      %35 = tpu.matmul %33, %34, %cst_27 {dimension_numbers = #tpu.dot_dimension_numbers<[1], [0], [0], [1], [0, 0, 1, 1], [], []>} : vector<128x128xbf16>, vector<128x128xbf16>, vector<128x128xf32> -> vector<128x128xf32>
      %c0_28 = arith.constant 0 : index
      %c0_29 = arith.constant 0 : index
      %36 = vector.load %arg4[%c0_28, %c0_29] : memref<128x128xbf16, #tpu.memory_space<vmem>>, vector<128x128xbf16>
      %c0_30 = arith.constant 0 : index
      %c0_31 = arith.constant 0 : index
      %37 = vector.load %arg8[%c0_30, %c0_31] : memref<128x128xbf16, #tpu.memory_space<vmem>>, vector<128x128xbf16>
      %cst_32 = arith.constant dense<0.000000e+00> : vector<128x128xf32>
      %38 = tpu.matmul %36, %37, %cst_32 {dimension_numbers = #tpu.dot_dimension_numbers<[1], [0], [0], [1], [0, 0, 1, 1], [], []>} : vector<128x128xbf16>, vector<128x128xbf16>, vector<128x128xf32> -> vector<128x128xf32>
      %39 = arith.addf %35, %38 : vector<128x128xf32>
      %c0_33 = arith.constant 0 : index
      %c0_34 = arith.constant 0 : index
      %40 = vector.load %arg9[%c0_33, %c0_34] : memref<1x128xf32, #tpu.memory_space<vmem>>, vector<1x128xf32>
      %41 = vector.broadcast %40 : vector<1x128xf32> to vector<128x128xf32>
      %42 = arith.addf %39, %41 : vector<128x128xf32>
      %cst_35 = arith.constant 0.000000e+00 : f32
      %43 = vector.broadcast %cst_35 : f32 to vector<128x128xf32>
      %44 = arith.maximumf %42, %43 : vector<128x128xf32>
      %45 = arith.mulf %44, %44 : vector<128x128xf32>
      %cst_36 = arith.constant dense<0.000000e+00> : vector<128xf32>
      %46 = vector.multi_reduction <add>, %45, %cst_36 [1] : vector<128x128xf32> to vector<128xf32>
      %47 = vector.shape_cast %46 : vector<128xf32> to vector<128x1xf32>
      %cst_37 = arith.constant 0.000000e+00 : f32
      %48 = vector.broadcast %cst_37 : f32 to vector<128x1xf32>
      %49 = arith.cmpf oeq, %47, %48 : vector<128x1xf32>
      %50 = math.rsqrt %47 : vector<128x1xf32>
      %cst_38 = arith.constant 1.000000e+00 : f32
      %51 = vector.broadcast %cst_38 : f32 to vector<128x1xf32>
      %52 = arith.select %49, %51, %50 : vector<128x1xi1>, vector<128x1xf32>
      %53 = vector.broadcast %52 : vector<128x1xf32> to vector<128x128xf32>
      %54 = arith.mulf %44, %53 : vector<128x128xf32>
      %c0_39 = arith.constant 0 : index
      %c0_40 = arith.constant 0 : index
      %55 = vector.load %arg10[%c0_39, %c0_40] : memref<128x128xf32, #tpu.memory_space<vmem>>, vector<128x128xf32>
      tpu.vector_store %arg10[%c0_39, %c0_40], %54 {strides = array<i32>} : memref<128x128xf32, #tpu.memory_space<vmem>>, vector<128x128xf32>,
    } else {
    }
    return
  }
  func.func @transform_0(%arg0: i32, %arg1: i32) -> (i32, i32) {
    %c0_i32 = arith.constant 0 : i32
    return %arg0, %arg1 : i32, i32
  }
  func.func @transform_1(%arg0: i32, %arg1: i32) -> (i32, i32) {
    %c0_i32 = arith.constant 0 : i32
    %c0_i32_0 = arith.constant 0 : i32
    return %arg1, %c0_i32 : i32, i32
  }
  func.func @transform_2(%arg0: i32, %arg1: i32) -> (i32, i32) {
    %c0_i32 = arith.constant 0 : i32
    %c0_i32_0 = arith.constant 0 : i32
    return %arg0, %c0_i32 : i32, i32
  }
  func.func @transform_3(%arg0: i32, %arg1: i32) -> (i32, i32) {
    %c0_i32 = arith.constant 0 : i32
    %c0_i32_0 = arith.constant 0 : i32
    %c0_i32_1 = arith.constant 0 : i32
    return %c0_i32, %c0_i32_0 : i32, i32
  }
  func.func @transform_4(%arg0: i32, %arg1: i32) -> (i32, i32) {
    %c0_i32 = arith.constant 0 : i32
    %c0_i32_0 = arith.constant 0 : i32
    %c0_i32_1 = arith.constant 0 : i32
    return %c0_i32, %c0_i32_0 : i32, i32
  }
  func.func @transform_5(%arg0: i32, %arg1: i32) -> (i32, i32) {
    %c0_i32 = arith.constant 0 : i32
    %c0_i32_0 = arith.constant 0 : i32
    %c0_i32_1 = arith.constant 0 : i32
    return %c0_i32, %c0_i32_0 : i32, i32
  }
  func.func @transform_6(%arg0: i32, %arg1: i32) -> (i32, i32) {
    %c0_i32 = arith.constant 0 : i32
    %c0_i32_0 = arith.constant 0 : i32
    %c0_i32_1 = arith.constant 0 : i32
    return %c0_i32, %c0_i32_0 : i32, i32
  }
  func.func @transform_7(%arg0: i32, %arg1: i32) -> (i32, i32) {
    %c0_i32 = arith.constant 0 : i32
    %c0_i32_0 = arith.constant 0 : i32
    %c0_i32_1 = arith.constant 0 : i32
    return %c0_i32, %c0_i32_0 : i32, i32
  }
  func.func @transform_8(%arg0: i32, %arg1: i32) -> (i32, i32) {
    %c0_i32 = arith.constant 0 : i32
    %c0_i32_0 = arith.constant 0 : i32
    return %arg0, %c0_i32 : i32, i32
  }
}

</mosaic_0001>

<bundles_post_ra>
// kernel: tpu_custom_call.1
= control target key start
LH: loop header
LB: loop body
LE: loop exit
PB: predicated region body
PF: predicated region fallthrough
CT: control target
= control target key end

     0   :  { %s3477_s0 = inlined_call_operand.hbm [shape: bf16[256,256], index: 0, kind: input, shape index: {}]   ;;  %s3478_s1 = inlined_call_operand.hbm [shape: bf16[256,128], index: 1, kind: input, shape index: {}]   ;;  %s3479_s2 = inlined_call_operand.hbm [shape: bf16[256,128], index: 2, kind: input, shape index: {}]   ;;  %s3480_s3 = inlined_call_operand.hbm [shape: bf16[128,128], index: 3, kind: input, shape index: {}]   ;;  %s3481_s4 = inlined_call_operand.vmem [shape: f32[1,128], index: 4, kind: input, shape index: {}]   ;;  %s3482_s5 = inlined_call_operand.hbm [shape: bf16[128,128], index: 5, kind: input, shape index: {}]   ;;  %s3483_s6 = inlined_call_operand.hbm [shape: bf16[128,128], index: 6, kind: input, shape index: {}]   ;;  %s3484_s7 = inlined_call_operand.vmem [shape: f32[1,128], index: 7, kind: input, shape index: {}]   ;;  %s3485_s8 = inlined_call_operand.hbm [shape: f32[256,128], index: 8, kind: output, shape index: {}]  }
   0x1   :  { %3496 = sst [smem:[#allocation30_spill]] %s3477_s0 }
   0x2   :  { %3497 = sst [smem:[#allocation31_spill]] %s3478_s1 }
   0x3   :  { %3498 = sst [smem:[#allocation32_spill]] %s3479_s2 }
   0x4   :  { %3499 = sst [smem:[#allocation33_spill]] %s3480_s3 }
   0x5   :  { %3500 = sst [smem:[#allocation34_spill]] %s3481_s4 }
   0x6   :  { %3501 = sst [smem:[#allocation35_spill]] %s3482_s5 }
   0x7   :  { %3502 = sst [smem:[#allocation36_spill]] %s3483_s6 }
   0x8   :  { %3503 = sst [smem:[#allocation37_spill]] %s3484_s7 }
   0x9   :  { %3504 = sst [smem:[#allocation38_spill]] %s3485_s8 }
   0xa   :  { %13 = vsyncpa [#allocation5], 0 }
   0xb   :  { %15 = vsyncpa [#allocation5 + $0x1], 0 }
   0xc   :  { %16 = vsyncpa [#allocation8], 0 }
   0xd   :  { %18 = vsyncpa [#allocation8 + $0x1], 0 }
   0xe   :  { %19 = vsyncpa [#allocation11], 0 }
   0xf   :  { %20 = vsyncpa [#allocation14], 0 }
  0x10   :  { %21 = vsyncpa [#allocation6], 0 }
  0x11   :  { %23 = vsyncpa [#allocation6 + $0x1], 0  ;;  %s2871_s27 = smov 0   ;;  %s2873_s28 = smov 0  }
  0x12   :  { %s2875_s29 = smov 0   ;;  %s2877_s30 = smov 0  }
  0x13   :  { %s2879_s9 = smov 0   ;;  %s2881_s10 = smov 0  }
  0x14   :  { %s2883_s11 = smov 0   ;;  %s2885_s12 = smov 0  }
  0x15   :  { %s2887_s13 = smov 0   ;;  %s2889_s14 = smov 0  }
  0x16   :  { %s2891_s15 = smov 0   ;;  %s2893_s16 = smov 0  }
  0x17   :  { %s2895_s17 = smov 0   ;;  %s2897_s18 = smov 0  }
  0x18 LB: > { %3505 = sst [smem:[#allocation22_spill]] %s2778_s9  ;;  %s2942_s19 = sadd.s32 4294967295, %s2814_s18   ;;  %s2814_s18 = sphi %s2897_s18, %s29_s18   ;;  %s2810_s17 = sphi %s2895_s17, %s3545_s17   ;;  %s2806_s16 = sphi %s2893_s16, %s3556_s16   ;;  %s2802_s15 = sphi %s2891_s15, %s3543_s15   ;;  %s2798_s14 = sphi %s2889_s14, %s3555_s14   ;;  %s2794_s13 = sphi %s2887_s13, %s3554_s13   ;;  %s2790_s12 = sphi %s2885_s12, %s3553_s12   ;;  %s2786_s11 = sphi %s2883_s11, %s3552_s11   ;;  %s2782_s10 = sphi %s2881_s10, %s3551_s10   ;;  %s2778_s9 = sphi %s2879_s9, %s3550_s9   ;;  %s2774_s30 = sphi %s2877_s30, %s3549_s30   ;;  %s2770_s29 = sphi %s2875_s29, %s3548_s29   ;;  %s2766_s28 = sphi %s2873_s28, %s3547_s28   ;;  %s2762_s27 = sphi %s2871_s27, %s3546_s27  }
  0x19   : > { %3506 = sst [smem:[#allocation23_spill]] %s2798_s14  ;;  %p1923_p0 = scmp.ge.s32.totalorder %s2814_s18, 1 }
  0x1a   : > { %3507 = sst [smem:[#allocation24_spill]] %s2802_s15  ;;  %p64_p1 = scmp.eq.s32.totalorder %s2942_s19, 0 }
  0x1b   : > { %3508 = sst [smem:[#allocation25_spill]] %s2810_s17  ;;  %p244_p2 = scmp.eq.s32.totalorder %s2942_s19, 3 }
  0x1c   : > { %p257_p3 = scmp.lt.s32.totalorder %s2814_s18, 5  ;;  %s3509_s3 = sld [smem:[#allocation33_spill]] }
  0x1d   : > { %s2816_s24 = smov [#allocation10]   ;;  %s3487_s20 = smov 64  }
  0x1e   : > { %p2951_p4 = pnand %p1923_p0, %p257_p3  ;;  %s270_s25 = sshll.u32 %s2816_s24, 4  ;;  %s271_s25 = int_to_ptr.vmem [resolvable:$true] %s270_s25 }
  0x1f   : > { %s3489_s21 = smov 4   ;;  %s38_s24 = sadd.s32 1, %s2806_s16 }
  0x20   : > { %s3510_s23 = scalar_select %p2951_p4, 1, 0 }
  0x21   : > { %p2249_p5 = pneg %p2951_p4  ;;  %p39_p7 = scmp.ge.s32.totalorder %s38_s24, 2 }
  0x22   : > { %s268_s22 = sshll.u32 %s3509_s3, 4  ;;  %3511 = sst [smem:[#allocation26_spill]] %s3510_s23  ;;  %s269_s22 = int_to_ptr.hbm [resolvable:$true] %s268_s22 }
  0x23   : > { %p2959_p6 = pnand %p2249_p5, %p64_p1  ;;  %s41_s3 = sadd.s32 1, %s2810_s17 }
  0x24   : > { %p58_p8 = scmp.eq.s32.totalorder %s2814_s18, 0  ;;  %s76_s8 = sadd.s32 1, %s2782_s10 }
  0x25   : > { %2252 = dma.hbm_to_vmem [thread:$0]  (!%p2959_p6), %s269_s22, 1024, %s271_s25, [#allocation11], %s3487_s20, %s3487_s20, %s3489_s21  }
  0x26   : > { %p83_p9 = scmp.ne.s32.totalorder %s2782_s10, %s2778_s9  ;;  %s3558_s24 = smov (%p39_p7, %s38_s24), 0 }
  0x27   : > { %3513 = sst [smem:[#allocation27_spill]] %s3558_s24  ;;  %s3560_s3 = smov (!%p39_p7, %s41_s3), %s2810_s17 }
  0x28   : > { %s46_s15 = ssub.s32 %s2806_s16, %s3558_s24  ;;  %p2981_p10 = por %p83_p9, %p58_p8 }
  0x29   : > { %p43_p11 = scmp.ge.s32.totalorder %s3560_s3, 2  ;;  %p74_p12 = scmp.eq.s32.totalorder %s46_s15, 0 }
  0x2a   : > { %p89_p13 = scmp.ne.s32.totalorder %s2778_s9, %s2774_s30  ;;  %p2276_p0 = scmp.lt.s32.totalorder %s2814_s18, 4 }
  0x2b   : > { %s3562_s3 = smov (%p43_p11, %s3560_s3), 0  ;;  %s342_s7 = sand.u32 1, %s2814_s18  }
  0x2c   : > { %3515 = sst [smem:[#allocation28_spill]] %s3562_s3  ;;  %s2995_s20 = ssub.s32 %s2810_s17, %s3562_s3 }
  0x2d   : > { %s2991_s25 = scalar_select %p74_p12, %s2782_s10, %s76_s8  }
  0x2e   : > { %p2999_p3 = por %p89_p13, %p64_p1  ;;  %s47_s24 = sor.u32 %s46_s15, %s2995_s20 }
  0x2f   : > { %3516 = sst [smem:[#allocation29_spill]] %s2991_s25  ;;  %p100_p5 = scmp.eq.s32.totalorder %s2995_s20, 0 }
  0x30   : > { %p3005_p7 = scmp.eq.s32.totalorder %s47_s24, 0  ;;  %s344_s8 = sand.u32 1, %s2782_s10  }
  0x31   : > { %s1932_s25 = sshll.u32 %s344_s8, 6  ;;  %s2146_s4 = sshll.u32 %s2806_s16, 6 }
  0x32   : > { %s3519_s1 = sld [smem:[#allocation31_spill]]  ;;  %s346_s2 = scalar_lea.vmem [#allocation7], %s1932_s25 }
  0x33   : > { %s354_s0 = sshll.u32 %s346_s2, 4  ;;  %p2263_p9 = pnand %p2276_p0, %p2981_p10  ;;  %s355_s0 = int_to_ptr.vmem [resolvable:$true] %s354_s0 }
  0x34   : > { %s3520_s5 = sld [smem:[#allocation35_spill]]  ;;  %s2819_s3 = smov [#allocation12]  }
  0x35   : > { %s287_s2 = sshll.u32 %s2819_s3, 4  ;;  %s3522_s14 = smov 64   ;;  %s288_s2 = int_to_ptr.vmem [resolvable:$true] %s287_s2 }
  0x36   : > { %s3523_s6 = sld [smem:[#allocation36_spill]]  ;;  %p57_p10 = scmp.ne.s32.totalorder %s2794_s13, %s2790_s12 }
  0x37   : > { %p63_p12 = scmp.ne.s32.totalorder %s2790_s12, %s2786_s11  ;;  %s2145_s26 = sshll.u32 %s2810_s17, 5 }
  0x38   : > { %s351_s9 = scalar_lea.hbm %s3519_s1, %s2146_s4  ;;  %s3022_s4 = scalar_lea.sflag [#allocation8], %s342_s7 }
  0x39   : > { %s352_s23 = sshll.u32 %s351_s9, 4  ;;  %s3521_s9 = smov 4   ;;  %s353_s23 = int_to_ptr.hbm [resolvable:$true] %s352_s23 }
  0x3a   : > { %s285_s8 = sshll.u32 %s3520_s5, 4  ;;  %s2820_s7 = smov [#allocation13]   ;;  %s286_s8 = int_to_ptr.hbm [resolvable:$true] %s285_s8 }
  0x3b   : > { %2265 = dma.hbm_to_vmem [thread:$0]  (!%p2263_p9), %s353_s23, 1024, %s355_s0, %s3022_s4, %s3522_s14, %s3522_s14, %s3521_s9  }
  0x3c   : > { %s299_s15 = sshll.u32 %s3523_s6, 4  ;;  %s301_s24 = sshll.u32 %s2820_s7, 4  ;;  %s300_s15 = int_to_ptr.hbm [resolvable:$true] %s299_s15  ;;  %s302_s24 = int_to_ptr.vmem [resolvable:$true] %s301_s24 }
  0x3d   : > { %2255 = dma.hbm_to_vmem [thread:$0]  (!%p2959_p6), %s286_s8, 1024, %s288_s2, [#allocation11], %s3522_s14, %s3522_s14, %s3521_s9  }
  0x3e   : > { %2258 = dma.hbm_to_vmem [thread:$0]  (!%p2959_p6), %s300_s15, 1024, %s302_s24, [#allocation14], %s3522_s14, %s3522_s14, %s3521_s9  }
  0x3f   : > { %s50_s0 = sadd.s32 1, %s2794_s13  ;;  %p3051_p11 = por %p58_p8, %p57_p10 }
  0x40   : > { %s3047_s23 = scalar_select %p3005_p7, %s2794_s13, %s50_s0  }
  0x41   : > { %s318_s8 = sand.u32 1, %s2794_s13   ;;  %p3061_p13 = por %p64_p1, %p63_p12 }
  0x42   : > { %s1928_s30 = sshll.u32 %s318_s8, 6  ;;  %s327_s22 = sadd.s32 %s2806_s16, %s2145_s26 }
  0x43   : > { %s1931_s25 = sshll.u32 %s327_s22, 2  ;;  %s3526_s7 = sld [smem:[#allocation30_spill]] }
  0x44   : > { %s322_s0 = scalar_lea.vmem [#allocation4], %s1928_s30  ;;  %p2260_p6 = pnand %p2276_p0, %p3051_p11 }
  0x45   : > { %s332_s1 = sshll.u32 %s322_s0, 4  ;;  %s319_s26 = scalar_lea.sflag [#allocation5], %s318_s8  ;;  %s333_s1 = int_to_ptr.vmem [resolvable:$true] %s332_s1 }
  0x46   : > { %s2821_s6 = smov 128   ;;  %s1922_s22 = sadd.s32 4294967294, %s2814_s18  }
  0x47   : > { %p109_p7 = scmp.ne.s32.totalorder %s2770_s29, %s2766_s28  ;;  %p115_p9 = scmp.ne.s32.totalorder %s2766_s28, %s2762_s27 }
  0x48   : > { %p250_p10 = scmp.eq.s32.totalorder %s1922_s22, 3  ;;  %s366_s15 = sand.u32 1, %s2770_s29  }
  0x49   : > { %s329_s24 = scalar_lea.hbm %s3526_s7, %s1931_s25  ;;  %s102_s25 = sadd.s32 1, %s2770_s29 }
  0x4a   : > { %s330_s5 = sshll.u32 %s329_s24, 4  ;;  %p111_p12 = por %p109_p7, %p58_p8  ;;  %s331_s5 = int_to_ptr.hbm [resolvable:$true] %s330_s5 }
  0x4b   : > { %2262 = dma.hbm_to_vmem [thread:$0]  (!%p2260_p6), %s331_s5, 1024, %s333_s1, %s319_s26, %s2821_s6, %s3522_s14, %s3521_s9  }
  0x4c   : > { %s3080_s30 = scalar_select %p100_p5, %s2770_s29, %s102_s25  }
  0x4d   : > { %p3091_p11 = por %p115_p9, %p64_p1  ;;  %p3097_p6 = por %p244_p2, %p109_p7 }
  0x4e   : > { %p3101_p5 = por %p250_p10, %p115_p9  ;;  %s1935_s6 = sshll.u32 %s366_s15, 6 }
  0x4f   : > { %s2147_s20 = sshll.u32 %s2810_s17, 6  ;;  %s3530_s7 = sld [smem:[#allocation32_spill]] }
  0x50   : > { %s368_s26 = scalar_lea.vmem [#allocation9], %s1935_s6  ;;  %p2266_p2 = pnand %p2276_p0, %p111_p12 }
  0x51   : > { %s376_s22 = sshll.u32 %s368_s26, 4  ;;  %s390_s15 = sand.u32 (!%p2951_p4), 1, %s2790_s12   ;;  %s377_s22 = int_to_ptr.vmem [resolvable:$true] %s376_s22 }
  0x52   : > { %s1939_s17 = sshll.u32 (!%p2951_p4), %s390_s15, 6  ;;  %s391_s8 = scalar_lea.sflag (!%p2951_p4), [#allocation5], %s390_s15 }
  0x53   : > { %388 = sbr.rel (%p2951_p4) target bundleno = 1097 (0x449), region = 52 }
  0x55   : > { %s373_s24 = scalar_lea.hbm %s3530_s7, %s2147_s20  ;;  %s3118_s20 = scalar_lea.vmem (!%p2951_p4), [#allocation4], %s1939_s17 }
  0x56   : > { %s374_s0 = sshll.u32 %s373_s24, 4  ;;  %s375_s0 = int_to_ptr.hbm [resolvable:$true] %s374_s0 }
  0x57   : > { %2268 = dma.hbm_to_vmem [thread:$0]  (!%p2266_p2), %s375_s0, 1024, %s377_s22, %s3022_s4, %s3522_s14, %s3522_s14, %s3521_s9  }
  0x58   : > { %2737 = dma.done.wait (%p3061_p13), %s391_s8, 1024  }
  0x59   : > { %2739 = vsyncadd (%p3061_p13), %s391_s8, 4294966272  ;;  %s3532_s6 = sld [smem:[#allocation22_spill]]  ;;  %s400_s11 = sand.u32 1, %s2942_s19  }
  0x5a   : > { %s401_s14 = scalar_lea.sflag [#allocation8], %s400_s11 }
  0x5f   : > { %s402_s4 = sand.u32 1, %s3532_s6  }
  0x60   : > { %s1940_s9 = sshll.u32 %s402_s4, 6 }
  0x61   : > { %s3126_s7 = scalar_lea.vmem [#allocation7], %s1940_s9 }
  0x62   : > { %2741 = dma.done.wait (%p2999_p3), %s401_s14, 1024  }
  0x63   : > { %2743 = vsyncadd (%p2999_p3), %s401_s14, 4294966272  ;;  %s3133_s17 = sand.u32 1, %s2766_s28  }
  0x64   : > { %s1941_s2 = sshll.u32 %s3133_s17, 6 }
  0x65   : > { %s3136_s24 = scalar_lea.vmem [#allocation9], %s1941_s2 }
  0x66   : > { %2745 = dma.done.wait (%p3091_p11), %s401_s14, 1024  }
  0x67   : > { %2747 = vsyncadd (%p3091_p11), %s401_s14, 4294966272 }
  0x68   : > { %2749 = dma.done.wait (%p64_p1), [#allocation11], 2048  }
  0x69   : > { %2751 = vsyncadd (%p64_p1), [#allocation11], 4294965248 }
  0x6a   : > { %2753 = dma.done.wait (%p64_p1), [#allocation14], 1024  }
  0x6b   : > { %2755 = vsyncadd (%p64_p1), [#allocation14], 4294966272  ;;  %s1945_s21 = sshll.u32 %s3133_s17, 7  ;;  %s3533_s26 = sld [smem:[#allocation23_spill]] }
  0x6c   : > { %s3151_s0 = scalar_lea.vmem [#allocation15], %s1945_s21 }
  0x71   : > { %p1946_p4 = scmp.ne.s32.totalorder %s3533_s26, 0 }
  0x73   : > { %480 = sbr.rel (%p1946_p4) target bundleno = 153 (0x99), region = 80 }
  0x78   : > { %v2822_v0 = vmov 0.0   ;;  %vm497_vm0 = vcmask 7168  }
  0x79   : > { %481 = vst [vmem:[#allocation2 + $0x30] sm:$0xff] %v2822_v0 }
  0x7a   : > { %482 = vst [vmem:[#allocation2] sm:$0xff] %v2822_v0 }
  0x7b   : > { %483 = vst [vmem:[#allocation2 + $0x58] sm:$0xff] %v2822_v0 }
  0x7c   : > { %484 = vst [vmem:[#allocation2 + $0x18] sm:$0xff] %v2822_v0 }
  0x7d   : > { %485 = vst [vmem:[#allocation2 + $0x50] sm:$0xff] %v2822_v0 }
  0x7e   : > { %486 = vst [vmem:[#allocation2 + $0x68] sm:$0xff] %v2822_v0 }
  0x7f   : > { %487 = vst [vmem:[#allocation2 + $0x8] sm:$0xff] %v2822_v0 }
  0x80   : > { %488 = vst [vmem:[#allocation2 + $0x48] sm:$0xff] %v2822_v0 }
  0x81   : > { %489 = vst [vmem:[#allocation2 + $0x40] sm:$0xff] %v2822_v0 }
  0x82   : > { %490 = vst [vmem:[#allocation2 + $0x20] sm:$0xff] %v2822_v0 }
  0x83   : > { %491 = vst [vmem:[#allocation2 + $0x10] sm:$0xff] %v2822_v0 }
  0x84   : > { %492 = vst [vmem:[#allocation2 + $0x38] sm:$0xff] %v2822_v0 }
  0x85   : > { %493 = vst [vmem:[#allocation2 + $0x60] sm:$0xff] %v2822_v0 }
  0x86   : > { %494 = vst [vmem:[#allocation2 + $0x70] sm:$0xff] %v2822_v0 }
  0x87   : > { %495 = vst [vmem:[#allocation2 + $0x78] sm:$0xff] %v2822_v0 }
  0x88   : > { %496 = vst [vmem:[#allocation2 + $0x28] sm:$0xff] %v2822_v0 }
  0x89   : > { %498 = vst.msk [vmem:[#allocation3] sm:$0xff] %vm497_vm0, %v2822_v0 }
  0x8a   : > { %499 = vst.msk [vmem:[#allocation3 + $0x8] sm:$0xff] %vm497_vm0, %v2822_v0 }
  0x8b   : > { %500 = vst.msk [vmem:[#allocation3 + $0x10] sm:$0xff] %vm497_vm0, %v2822_v0 }
  0x8c   : > { %501 = vst.msk [vmem:[#allocation3 + $0x18] sm:$0xff] %vm497_vm0, %v2822_v0 }
  0x8d   : > { %502 = vst.msk [vmem:[#allocation3 + $0x20] sm:$0xff] %vm497_vm0, %v2822_v0 }
  0x8e   : > { %503 = vst.msk [vmem:[#allocation3 + $0x28] sm:$0xff] %vm497_vm0, %v2822_v0 }
  0x8f   : > { %504 = vst.msk [vmem:[#allocation3 + $0x30] sm:$0xff] %vm497_vm0, %v2822_v0 }
  0x90   : > { %505 = vst.msk [vmem:[#allocation3 + $0x38] sm:$0xff] %vm497_vm0, %v2822_v0 }
  0x91   : > { %506 = vst.msk [vmem:[#allocation3 + $0x40] sm:$0xff] %vm497_vm0, %v2822_v0 }
  0x92   : > { %507 = vst.msk [vmem:[#allocation3 + $0x48] sm:$0xff] %vm497_vm0, %v2822_v0 }
  0x93   : > { %508 = vst.msk [vmem:[#allocation3 + $0x50] sm:$0xff] %vm497_vm0, %v2822_v0 }
  0x94   : > { %509 = vst.msk [vmem:[#allocation3 + $0x58] sm:$0xff] %vm497_vm0, %v2822_v0 }
  0x95   : > { %510 = vst.msk [vmem:[#allocation3 + $0x60] sm:$0xff] %vm497_vm0, %v2822_v0 }
  0x96   : > { %511 = vst.msk [vmem:[#allocation3 + $0x68] sm:$0xff] %vm497_vm0, %v2822_v0 }
  0x97   : > { %512 = vst.msk [vmem:[#allocation3 + $0x70] sm:$0xff] %vm497_vm0, %v2822_v0 }
  0x98   : > { %513 = vst.msk [vmem:[#allocation3 + $0x78] sm:$0xff] %vm497_vm0, %v2822_v0 }
  0x99 PF: > { %v2171_v1 = vld [vmem:[#allocation10 + $0x38] sm:$0xff]  ;;  %v2170_v2 = vld [vmem:[#allocation10 + $0x30] sm:$0xff]  ;;  %v2169_v3 = vld [vmem:[#allocation10 + $0x28] sm:$0xff]  ;;  %s3534_s22 = sld [smem:[#allocation34_spill]]  ;;  %vm960_vm1 = vcmask 7168  }
  0x9a   : > { %2197 = vmatpush.bf16.msra.mxu2 %v2171_v1  ;;  %662 = vmatpush.bf16.msra.mxu0 %v2171_v1  ;;  %v2168_v4 = vld [vmem:[#allocation10 + $0x20] sm:$0xff]  ;;  %v2167_v5 = vld [vmem:[#allocation10 + $0x18] sm:$0xff]  ;;  %v2166_v6 = vld [vmem:[#allocation10 + $0x10] sm:$0xff]  ;;  %s3535_s25 = sld [smem:[#allocation23_spill]] }
  0x9b   : > { %v2165_v7 = vld [vmem:[#allocation10 + $0x8] sm:$0xff]  ;;  %v2164_v8 = vld [vmem:[#allocation10] sm:$0xff]  ;;  %v2162_v13 = vld [vmem:[%s3126_s7 + $0x30] sm:$0xff] }
  0x9c   : > { %v2160_v9 = vld [vmem:[%s3126_s7 + $0x20] sm:$0xff]  ;;  %v2161_v11 = vld [vmem:[%s3126_s7 + $0x28] sm:$0xff]  ;;  %v2158_v14 = vld [vmem:[%s3126_s7 + $0x10] sm:$0xff] }
  0x9d   : > { %v2156_v10 = vld [vmem:[%s3126_s7] sm:$0xff]  ;;  %v2157_v12 = vld [vmem:[%s3126_s7 + $0x8] sm:$0xff]  ;;  %v2163_v15 = vld [vmem:[%s3126_s7 + $0x38] sm:$0xff] }
  0x9e   : > { %2198 = vmatpush.bf16.msra.mxu2 %v2170_v2  ;;  %663 = vmatpush.bf16.msra.mxu0 %v2170_v2  ;;  %v2159_v16 = vld [vmem:[%s3126_s7 + $0x18] sm:$0xff] }
  0x9f   : > { %v2403_v30 = vld [vmem:[%s3534_s22] ss:$0 sm:$0xff] }
  0xa0   : > { %p2043_p1 = scmp.ne.s32.totalorder %s3535_s25, 1 }
  0xa2   : > { %2199 = vmatpush.bf16.msra.mxu2 %v2169_v3  ;;  %664 = vmatpush.bf16.msra.mxu0 %v2169_v3 }
  0xa6   : > { %2200 = vmatpush.bf16.msra.mxu2 %v2168_v4  ;;  %665 = vmatpush.bf16.msra.mxu0 %v2168_v4 }
  0xaa   : > { %2201 = vmatpush.bf16.msra.mxu2 %v2167_v5  ;;  %666 = vmatpush.bf16.msra.mxu0 %v2167_v5 }
  0xae   : > { %2202 = vmatpush.bf16.msra.mxu2 %v2166_v6  ;;  %667 = vmatpush.bf16.msra.mxu0 %v2166_v6 }
  0xb2   : > { %2203 = vmatpush.bf16.msra.mxu2 %v2165_v7  ;;  %668 = vmatpush.bf16.msra.mxu0 %v2165_v7 }
  0xb6   : > { %2204 = vmatpush.bf16.msra.mxu2 %v2164_v8  ;;  %669 = vmatpush.bf16.msra.mxu0 %v2164_v8 }
  0xb9   : > { %690 = vmatmul.bf16.vlgmr.msra.gmra.mxu2 %v2160_v9  ;;  %670 = vmatmul.bf16.vlgmr.msra.gmra.mxu0 %v2156_v10  ;;  %v2148_v10 = vld [vmem:[%s3118_s20] sm:$0xff] }
  0xc9   : > { %695 = vmatmul.bf16.gmra.mxu2 %v2161_v11  ;;  %675 = vmatmul.bf16.gmra.mxu0 %v2157_v12  ;;  %v2152_v11 = vld [vmem:[%s3118_s20 + $0x20] sm:$0xff] }
  0xca   : > { %v514_v12 = vld [vmem:[%s3118_s20] sm:$0xff]  }
  0xd9   : > { %700 = vmatmul.bf16.gmra.mxu2 %v2162_v13  ;;  %680 = vmatmul.bf16.gmra.mxu0 %v2158_v14  ;;  %v896_v13 = vunpack.c.l.bf16 %v514_v12  ;;  %v518_v14 = vld [vmem:[%s3118_s20 + $0x10] sm:$0xff]  }
  0xdb   : > { %912 = vadd.xlane.f32.xlu0 %v896_v13  ;;  %v887_v13 = vld [vmem:[#allocation3 + $0x38] sm:$0xff] }
  0xe9   : > { %705 = vmatmul.bf16.gmra.mxu2 %v2163_v15  ;;  %685 = vmatmul.bf16.gmra.mxu0 %v2159_v16  ;;  %v516_v15 = vld [vmem:[%s3118_s20 + $0x8] sm:$0xff]   ;;  %v900_v16 = vunpack.c.l.bf16 %v518_v14 }
  0xeb   : > { %920 = vadd.xlane.f32.xlu2 %v900_v16 }
 0x136   : > { %v671_v17 = vpop.f32.mrf.mxu0 }
 0x137   : > { %v672_v1 = vadd.f32 %v2403_v30, %v671_v17  ;;  %v898_v17 = vunpack.c.l.bf16 %v516_v15 }
 0x139   : > { %v711_v6 = vmax.f32 %v672_v1, 0.0  ;;  %916 = vadd.xlane.f32.xlu1 %v898_v17 }
 0x13c   : > { %v691_v18 = vpop.f32.mrf.mxu2 }
 0x13d   : > { %v692_v47 = vadd.f32 %v2403_v30, %v691_v18  ;;  %v897_v18 = vunpack.c.h.bf16 %v514_v12  ;;  %v888_v12 = vld [vmem:[#allocation3 + $0x40] sm:$0xff] }
 0x13e   : > { %v673_v19 = vpop.f32.mrf.mxu0 }
 0x13f   : > { %v719_v54 = vmax.f32 %v692_v47, 0.0  ;;  %v674_v2 = vadd.f32 %v2403_v30, %v673_v19  ;;  %914 = vadd.xlane.f32.xlu0 %v897_v18  ;;  %v2149_v19 = vld [vmem:[%s3118_s20 + $0x8] sm:$0xff]  ;;  %v884_v47 = vld [vmem:[#allocation3 + $0x20] sm:$0xff] }
 0x141   : > { %v712_v7 = vmax.f32 %v674_v2, 0.0 }
 0x143   : > { %v743_v9 = vpack.c.bf16 %v712_v7, %v711_v6 }
 0x144   : > { %v693_v20 = vpop.f32.mrf.mxu2 }
 0x145   : > { %v694_v44 = vadd.f32 %v2403_v30, %v693_v20  ;;  %v2153_v20 = vld [vmem:[%s3118_s20 + $0x28] sm:$0xff] }
 0x146   : > { %v676_v22 = vpop.f32.mrf.mxu0 }
 0x147   : > { %v720_v50 = vmax.f32 %v694_v44, 0.0  ;;  %v677_v60 = vadd.f32 %v2403_v30, %v676_v22  ;;  %v901_v22 = vunpack.c.h.bf16 %v518_v14  ;;  %v889_v14 = vld [vmem:[#allocation3 + $0x48] sm:$0xff] }
 0x149   : > { %v747_v55 = vpack.c.bf16 %v720_v50, %v719_v54  ;;  %v713_v3 = vmax.f32 %v677_v60, 0.0  ;;  %922 = vadd.xlane.f32.xlu2 %v901_v22 }
 0x14c   : > { %v696_v21 = vpop.f32.mrf.mxu2 }
 0x14d   : > { %v697_v42 = vadd.f32 %v2403_v30, %v696_v21  ;;  %v520_v21 = vld [vmem:[%s3118_s20 + $0x18] sm:$0xff]  }
 0x14e   : > { %v678_v24 = vpop.f32.mrf.mxu0  ;;  %v913_v44 = vpop.xlane.xlu0 %912 }
 0x14f   : > { %v721_v49 = vmax.f32 %v697_v42, 0.0  ;;  %v679_v61 = vadd.f32 %v2403_v30, %v678_v24  ;;  %v902_v24 = vunpack.c.l.bf16 %v520_v21  ;;  %v2151_v42 = vld [vmem:[%s3118_s20 + $0x18] sm:$0xff] }
 0x151   : > { %v714_v4 = vmax.f32 %v679_v61, 0.0  ;;  %924 = vadd.xlane.f32.xlu0 %v902_v24  ;;  %v885_v61 = vld [vmem:[#allocation3 + $0x28] sm:$0xff]  ;;  %v737_v24 = vld [vmem:[#allocation2 + $0x10] sm:$0xff] }
 0x153   : > { %v744_v8 = vpack.c.bf16 %v714_v4, %v713_v3 }
 0x154   : > { %v698_v23 = vpop.f32.mrf.mxu2 }
 0x155   : > { %v699_v39 = vadd.f32 %v2403_v30, %v698_v23  ;;  %v899_v23 = vunpack.c.h.bf16 %v516_v15 }
 0x156   : > { %v681_v26 = vpop.f32.mrf.mxu0 }
 0x157   : > { %v722_v45 = vmax.f32 %v699_v39, 0.0  ;;  %v682_v56 = vadd.f32 %v2403_v30, %v681_v26  ;;  %918 = vadd.xlane.f32.xlu1 %v899_v23 }
 0x159   : > { %v748_v53 = vpack.c.bf16 %v722_v45, %v721_v49  ;;  %v715_v62 = vmax.f32 %v682_v56, 0.0  ;;  %v882_v49 = vld [vmem:[#allocation3 + $0x10] sm:$0xff] }
 0x15c   : > { %v701_v25 = vpop.f32.mrf.mxu2 }
 0x15d   : > { %v702_v36 = vadd.f32 %v2403_v30, %v701_v25  ;;  %v522_v25 = vld [vmem:[%s3118_s20 + $0x20] sm:$0xff]  }
 0x15e   : > { %v683_v28 = vpop.f32.mrf.mxu0  ;;  %v904_v26 = vunpack.c.l.bf16 %v522_v25 }
 0x15f   : > { %v723_v43 = vmax.f32 %v702_v36, 0.0  ;;  %v684_v57 = vadd.f32 %v2403_v30, %v683_v28  ;;  %v905_v28 = vunpack.c.h.bf16 %v522_v25  ;;  %v528_v36 = vld [vmem:[%s3118_s20 + $0x38] sm:$0xff]  }
 0x160   : > { %928 = vadd.xlane.f32.xlu2 %v904_v26  ;;  %v730_v25 = vld [vmem:[#allocation2 + $0x18] sm:$0xff] }
 0x161   : > { %v716_v63 = vmax.f32 %v684_v57, 0.0  ;;  %930 = vadd.xlane.f32.xlu0 %v905_v28  ;;  %v890_v28 = vld [vmem:[#allocation3 + $0x50] sm:$0xff] }
 0x163   : > { %v745_v5 = vpack.c.bf16 %v716_v63, %v715_v62  ;;  %v883_v62 = vld [vmem:[#allocation3 + $0x18] sm:$0xff]  ;;  %v886_v63 = vld [vmem:[#allocation3 + $0x30] sm:$0xff] }
 0x164   : > { %v703_v27 = vpop.f32.mrf.mxu2 }
 0x165   : > { %v704_v34 = vadd.f32 %v2403_v30, %v703_v27  ;;  %v903_v27 = vunpack.c.h.bf16 %v520_v21 }
 0x166   : > { %v686_v32 = vpop.f32.mrf.mxu0 }
 0x167   : > { %v724_v40 = vmax.f32 %v704_v34, 0.0  ;;  %v687_v51 = vadd.f32 %v2403_v30, %v686_v32  ;;  %926 = vadd.xlane.f32.xlu1 %v903_v27  ;;  %v2154_v32 = vld [vmem:[%s3118_s20 + $0x30] sm:$0xff]  ;;  %v891_v27 = vld [vmem:[#allocation3 + $0x58] sm:$0xff] }
 0x169   : > { %v749_v46 = vpack.c.bf16 %v724_v40, %v723_v43  ;;  %v717_v58 = vmax.f32 %v687_v51, 0.0  ;;  %v911_v40 = vunpack.c.h.bf16 %v528_v36  ;;  %v880_v43 = vld [vmem:[#allocation3] sm:$0xff]  ;;  %v881_v51 = vld [vmem:[#allocation3 + $0x8] sm:$0xff] }
 0x16a   : > { %v944_v45 = vadd.f32 %v913_v44, %v880_v43  ;;  %v893_v43 = vld [vmem:[#allocation3 + $0x68] sm:$0xff]  ;;  %v895_v44 = vld [vmem:[#allocation3 + $0x78] sm:$0xff] }
 0x16c   : > { %v706_v29 = vpop.f32.mrf.mxu2  ;;  %961 = vst.msk [vmem:[#allocation3] sm:$0xff] %vm960_vm1, %v944_v45 }
 0x16d   : > { %v707_v31 = vadd.f32 %v2403_v30, %v706_v29  ;;  %v525_v29 = vld [vmem:[%s3118_s20 + $0x2c] sm:$0xff]  }
 0x16e   : > { %v688_v48 = vpop.f32.mrf.mxu0 }
 0x16f   : > { %v725_v37 = vmax.f32 %v707_v31, 0.0  ;;  %v689_v52 = vadd.f32 %v2403_v30, %v688_v48  ;;  %v2150_v31 = vld [vmem:[%s3118_s20 + $0x10] sm:$0xff]  ;;  %v921_v48 = vpop.xlane.xlu2 %920 }
 0x171   : > { %v718_v59 = vmax.f32 %v689_v52, 0.0  ;;  %v948_v52 = vadd.f32 %v921_v48, %v884_v47 }
 0x173   : > { %v746_v0 = vpack.c.bf16 %v718_v59, %v717_v58  ;;  %965 = vst.msk [vmem:[#allocation3 + $0x20] sm:$0xff] %vm960_vm1, %v948_v52  ;;  %v735_v58 = vld [vmem:[#allocation2 + $0x40] sm:$0xff] }
 0x174   : > { %v708_v33 = vpop.f32.mrf.mxu2  ;;  %v728_v59 = vld [vmem:[#allocation2] sm:$0xff] }
 0x175   : > { %v709_v35 = vadd.f32 %v2403_v30, %v708_v33  ;;  %v524_v30 = vld [vmem:[%s3118_s20 + $0x28] sm:$0xf]  ;;  %v907_v33 = vunpack.c.l.bf16 %v525_v29 }
 0x176   : > { %v906_v34 = vunpack.c.l.bf16 %v524_v30 }
 0x177   : > { %v726_v38 = vmax.f32 %v709_v35, 0.0  ;;  %v908_v35 = vunpack.c.h.bf16 %v525_v29  ;;  %934 = vadd.xlane.f32.xlu2 %v907_v33  ;;  %v892_v29 = vld [vmem:[#allocation3 + $0x60] sm:$0xff] }
 0x178   : > { %932 = vadd.xlane.f32.xlu1 %v906_v34 }
 0x179   : > { %v750_v41 = vpack.c.bf16 %v726_v38, %v725_v37  ;;  %936 = vadd.xlane.f32.xlu0 %v908_v35  ;;  %v527_v37 = vld [vmem:[%s3118_s20 + $0x34] sm:$0xf]  ;;  %v910_v38 = vunpack.c.l.bf16 %v528_v36 }
 0x17a   : > { %v909_v39 = vunpack.c.l.bf16 %v527_v37 }
 0x17b   : > { %799 = vmatpush.bf16.msra.mxu1 %v750_v41  ;;  %2205 = vmatpush.bf16.msra.mxu3 %v750_v41  ;;  %v2155_v41 = vld [vmem:[%s3118_s20 + $0x38] sm:$0xff]  ;;  %s3536_s20 = sld [smem:[#allocation37_spill]] (!%p2043_p1) }
 0x17f   : > { %800 = vmatpush.bf16.msra.mxu1 %v749_v46  ;;  %2206 = vmatpush.bf16.msra.mxu3 %v749_v46  ;;  %v727_v46 = vld [vmem:[#allocation2 + $0x30] sm:$0xff] }
 0x180   : > { %940 = vadd.xlane.f32.xlu2 %v910_v38  ;;  %938 = vadd.xlane.f32.xlu1 %v909_v39  ;;  %v738_v39 = vld [vmem:[#allocation2 + $0x38] sm:$0xff] }
 0x181   : > { %942 = vadd.xlane.f32.xlu0 %v911_v40  ;;  %v731_v40 = vld [vmem:[#allocation2 + $0x50] sm:$0xff] }
 0x183   : > { %801 = vmatpush.bf16.msra.mxu1 %v748_v53  ;;  %2207 = vmatpush.bf16.msra.mxu3 %v748_v53 }
 0x187   : > { %802 = vmatpush.bf16.msra.mxu1 %v747_v55  ;;  %2208 = vmatpush.bf16.msra.mxu3 %v747_v55 }
 0x18b   : > { %803 = vmatpush.bf16.msra.mxu1 %v746_v0  ;;  %2209 = vmatpush.bf16.msra.mxu3 %v746_v0 }
 0x18f   : > { %804 = vmatpush.bf16.msra.mxu1 %v745_v5  ;;  %2210 = vmatpush.bf16.msra.mxu3 %v745_v5 }
 0x193   : > { %805 = vmatpush.bf16.msra.mxu1 %v744_v8  ;;  %2211 = vmatpush.bf16.msra.mxu3 %v744_v8 }
 0x197   : > { %806 = vmatpush.bf16.msra.mxu1 %v743_v9  ;;  %2212 = vmatpush.bf16.msra.mxu3 %v743_v9  ;;  %v736_v9 = vld [vmem:[#allocation2 + $0x20] sm:$0xff] }
 0x19a   : > { %807 = vmatmul.bf16.vlgmr.msra.gmra.mxu1 %v2148_v10  ;;  %827 = vmatmul.bf16.vlgmr.msra.gmra.mxu3 %v2152_v11  ;;  %v729_v10 = vld [vmem:[#allocation2 + $0x58] sm:$0xff] }
 0x1aa   : > { %812 = vmatmul.bf16.gmra.mxu1 %v2149_v19  ;;  %832 = vmatmul.bf16.gmra.mxu3 %v2153_v20 }
 0x1ac   : > { %v917_v50 = vpop.xlane.xlu1 %916 }
 0x1ad   : > { %v946_v53 = vadd.f32 %v917_v50, %v882_v49 }
 0x1af   : > { %963 = vst.msk [vmem:[#allocation3 + $0x10] sm:$0xff] %vm960_vm1, %v946_v53 }
 0x1b2   : > { %v915_v54 = vpop.xlane.xlu0 %914 }
 0x1b3   : > { %v945_v56 = vadd.f32 %v915_v54, %v881_v51  ;;  %v739_v54 = vld [vmem:[#allocation2 + $0x60] sm:$0xff] }
 0x1b5   : > { %962 = vst.msk [vmem:[#allocation3 + $0x8] sm:$0xff] %vm960_vm1, %v945_v56  ;;  %v732_v56 = vld [vmem:[#allocation2 + $0x68] sm:$0xff] }
 0x1ba   : > { %817 = vmatmul.bf16.gmra.mxu1 %v2150_v31  ;;  %837 = vmatmul.bf16.gmra.mxu3 %v2154_v32 }
 0x1bc   : > { %v923_v1 = vpop.xlane.xlu2 %922 }
 0x1bd   : > { %v949_v4 = vadd.f32 %v923_v1, %v885_v61 }
 0x1bf   : > { %966 = vst.msk [vmem:[#allocation3 + $0x28] sm:$0xff] %vm960_vm1, %v949_v4  ;;  %v734_v4 = vld [vmem:[#allocation2 + $0x48] sm:$0xff] }
 0x1c4   : > { %v925_v6 = vpop.xlane.xlu0 %924 }
 0x1c5   : > { %v950_v8 = vadd.f32 %v925_v6, %v886_v63 }
 0x1c7   : > { %967 = vst.msk [vmem:[#allocation3 + $0x30] sm:$0xff] %vm960_vm1, %v950_v8  ;;  %v742_v8 = vld [vmem:[#allocation2 + $0x28] sm:$0xff] }
 0x1ca   : > { %842 = vmatmul.bf16.gmra.mxu3 %v2155_v41  ;;  %822 = vmatmul.bf16.gmra.mxu1 %v2151_v42  ;;  %v919_v2 = vpop.xlane.xlu1 %918  ;;  %v894_v42 = vld [vmem:[#allocation3 + $0x70] sm:$0xff] }
 0x1cb   : > { %v947_v5 = vadd.f32 %v919_v2, %v883_v62  ;;  %v733_v62 = vld [vmem:[#allocation2 + $0x8] sm:$0xff]  ;;  %v741_v2 = vld [vmem:[#allocation2 + $0x78] sm:$0xff] }
 0x1cd   : > { %964 = vst.msk [vmem:[#allocation3 + $0x18] sm:$0xff] %vm960_vm1, %v947_v5 }
 0x1d3   : > { %v929_v16 = vpop.xlane.xlu2 %928 }
 0x1d4   : > { %v952_v19 = vadd.f32 %v929_v16, %v888_v12  ;;  %v931_v21 = vpop.xlane.xlu0 %930 }
 0x1d5   : > { %v953_v23 = vadd.f32 %v931_v21, %v889_v14 }
 0x1d6   : > { %969 = vst.msk [vmem:[#allocation3 + $0x40] sm:$0xff] %vm960_vm1, %v952_v19 }
 0x1d7   : > { %970 = vst.msk [vmem:[#allocation3 + $0x48] sm:$0xff] %vm960_vm1, %v953_v23 }
 0x1da   : > { %v927_v17 = vpop.xlane.xlu1 %926 }
 0x1db   : > { %v951_v20 = vadd.f32 %v927_v17, %v887_v13 }
 0x1dd   : > { %968 = vst.msk [vmem:[#allocation3 + $0x38] sm:$0xff] %vm960_vm1, %v951_v20 }
 0x1ea   : > { %v935_v31 = vpop.xlane.xlu2 %934 }
 0x1eb   : > { %v933_v32 = vpop.xlane.xlu1 %932  ;;  %v955_v34 = vadd.f32 %v935_v31, %v891_v27 }
 0x1ec   : > { %v954_v35 = vadd.f32 %v933_v32, %v890_v28  ;;  %v937_v36 = vpop.xlane.xlu0 %936 }
 0x1ed   : > { %v956_v38 = vadd.f32 %v937_v36, %v892_v29  ;;  %972 = vst.msk [vmem:[#allocation3 + $0x58] sm:$0xff] %vm960_vm1, %v955_v34 }
 0x1ee   : > { %971 = vst.msk [vmem:[#allocation3 + $0x50] sm:$0xff] %vm960_vm1, %v954_v35 }
 0x1ef   : > { %973 = vst.msk [vmem:[#allocation3 + $0x60] sm:$0xff] %vm960_vm1, %v956_v38 }
 0x1f3   : > { %v939_v47 = vpop.xlane.xlu1 %938 }
 0x1f4   : > { %v957_v50 = vadd.f32 %v939_v47, %v893_v43  ;;  %v943_v51 = vpop.xlane.xlu0 %942 }
 0x1f5   : > { %v959_v53 = vadd.f32 %v943_v51, %v895_v44 }
 0x1f6   : > { %974 = vst.msk [vmem:[#allocation3 + $0x68] sm:$0xff] %vm960_vm1, %v957_v50 }
 0x1f7   : > { %976 = vst.msk [vmem:[#allocation3 + $0x78] sm:$0xff] %vm960_vm1, %v959_v53 }
 0x217   : > { %v808_v55 = vpop.f32.mrf.mxu1 }
 0x218   : > { %v848_v57 = vadd.f32 %v808_v55, %v727_v46  ;;  %v941_v46 = vpop.xlane.xlu2 %940 }
 0x219   : > { %v958_v49 = vadd.f32 %v941_v46, %v894_v42 }
 0x21a   : > { %864 = vst [vmem:[#allocation2 + $0x30] sm:$0xff] %v848_v57 }
 0x21b   : > { %975 = vst.msk [vmem:[#allocation3 + $0x70] sm:$0xff] %vm960_vm1, %v958_v49 }
 0x21d   : > { %v828_v60 = vpop.f32.mrf.mxu3 }
 0x21e   : > { %v856_v0 = vadd.f32 %v828_v60, %v735_v58  ;;  %v740_v60 = vld [vmem:[#allocation2 + $0x70] sm:$0xff] }
 0x21f   : > { %v810_v3 = vpop.f32.mrf.mxu1 }
 0x220   : > { %872 = vst [vmem:[#allocation2 + $0x40] sm:$0xff] %v856_v0  ;;  %v849_v7 = vadd.f32 %v810_v3, %v728_v59 }
 0x222   : > { %865 = vst [vmem:[#allocation2] sm:$0xff] %v849_v7 }
 0x225   : > { %v830_v11 = vpop.f32.mrf.mxu3 }
 0x226   : > { %v857_v15 = vadd.f32 %v830_v11, %v736_v9 }
 0x227   : > { %v813_v18 = vpop.f32.mrf.mxu1 }
 0x228   : > { %873 = vst [vmem:[#allocation2 + $0x20] sm:$0xff] %v857_v15  ;;  %v850_v22 = vadd.f32 %v813_v18, %v729_v10 }
 0x22a   : > { %866 = vst [vmem:[#allocation2 + $0x58] sm:$0xff] %v850_v22 }
 0x22d   : > { %v833_v26 = vpop.f32.mrf.mxu3 }
 0x22e   : > { %v858_v30 = vadd.f32 %v833_v26, %v737_v24 }
 0x22f   : > { %v815_v33 = vpop.f32.mrf.mxu1 }
 0x230   : > { %874 = vst [vmem:[#allocation2 + $0x10] sm:$0xff] %v858_v30  ;;  %v851_v37 = vadd.f32 %v815_v33, %v730_v25 }
 0x232   : > { %867 = vst [vmem:[#allocation2 + $0x18] sm:$0xff] %v851_v37 }
 0x235   : > { %v835_v41 = vpop.f32.mrf.mxu3 }
 0x236   : > { %v859_v45 = vadd.f32 %v835_v41, %v738_v39 }
 0x237   : > { %v818_v48 = vpop.f32.mrf.mxu1 }
 0x238   : > { %875 = vst [vmem:[#allocation2 + $0x38] sm:$0xff] %v859_v45  ;;  %v852_v52 = vadd.f32 %v818_v48, %v731_v40 }
 0x23a   : > { %868 = vst [vmem:[#allocation2 + $0x50] sm:$0xff] %v852_v52 }
 0x23d   : > { %v838_v55 = vpop.f32.mrf.mxu3 }
 0x23e   : > { %v860_v57 = vadd.f32 %v838_v55, %v739_v54 }
 0x23f   : > { %v820_v58 = vpop.f32.mrf.mxu1 }
 0x240   : > { %876 = vst [vmem:[#allocation2 + $0x60] sm:$0xff] %v860_v57  ;;  %v853_v59 = vadd.f32 %v820_v58, %v732_v56 }
 0x242   : > { %869 = vst [vmem:[#allocation2 + $0x68] sm:$0xff] %v853_v59 }
 0x245   : > { %v840_v61 = vpop.f32.mrf.mxu3 }
 0x246   : > { %v861_v63 = vadd.f32 %v840_v61, %v740_v60 }
 0x247   : > { %v823_v0 = vpop.f32.mrf.mxu1 }
 0x248   : > { %877 = vst [vmem:[#allocation2 + $0x70] sm:$0xff] %v861_v63  ;;  %v854_v1 = vadd.f32 %v823_v0, %v733_v62 }
 0x24a   : > { %870 = vst [vmem:[#allocation2 + $0x8] sm:$0xff] %v854_v1 }
 0x24d   : > { %v843_v3 = vpop.f32.mrf.mxu3 }
 0x24e   : > { %v862_v5 = vadd.f32 %v843_v3, %v741_v2 }
 0x24f   : > { %v825_v6 = vpop.f32.mrf.mxu1 }
 0x250   : > { %878 = vst [vmem:[#allocation2 + $0x78] sm:$0xff] %v862_v5  ;;  %v855_v7 = vadd.f32 %v825_v6, %v734_v4 }
 0x252   : > { %871 = vst [vmem:[#allocation2 + $0x48] sm:$0xff] %v855_v7 }
 0x254   : > { %980 = sbr.rel (%p2043_p1) target bundleno = 1075 (0x433), region = 84 }
 0x255   : > { %v845_v9 = vpop.f32.mrf.mxu3 }
 0x256   : > { %v863_v10 = vadd.f32 %v845_v9, %v742_v8 }
 0x258   : > { %879 = vst [vmem:[#allocation2 + $0x28] sm:$0xff] %v863_v10 }
 0x259   : > { %v989_v11 = vld [vmem:[#allocation3 + $0x40] sm:$0xff]  ;;  %v991_v13 = vld [vmem:[#allocation3 + $0x50] sm:$0xff]  ;;  %v2823_v14 = vmov 0   ;;  %v990_v18 = vld [vmem:[#allocation3 + $0x48] sm:$0xff] }
 0x25a   : > { %v981_v12 = vld [vmem:[#allocation3] sm:$0xff]  ;;  %2405 = vset.pattern.permute.xlu1 %v2823_v14  ;;  %2404 = vset.pattern.permute.xlu0 %v2823_v14  ;;  %v1005_v15 = vmax.f32 %v989_v11, 1.0  ;;  %v1007_v17 = vmax.f32 %v991_v13, 1.0  ;;  %v982_v19 = vld [vmem:[#allocation3 + $0x8] sm:$0xff]  ;;  %v992_v20 = vld [vmem:[#allocation3 + $0x58] sm:$0xff]  ;;  %v1006_v21 = vmax.f32 %v990_v18, 1.0 }
 0x25b   : > { %v997_v16 = vmax.f32 %v981_v12, 1.0  ;;  %2406 = vset.pattern.permute.xlu2 %v2823_v14  ;;  %v998_v22 = vmax.f32 %v982_v19, 1.0  ;;  %v1008_v23 = vmax.f32 %v992_v20, 1.0  ;;  %v983_v26 = vld [vmem:[#allocation3 + $0x10] sm:$0xff]  ;;  %v984_v28 = vld [vmem:[#allocation3 + $0x18] sm:$0xff]  ;;  %v993_v29 = vld [vmem:[#allocation3 + $0x60] sm:$0xff] }
 0x25c   : > { %2408 = vrcp.f32 %v1005_v15  ;;  %v999_v30 = vmax.f32 %v983_v26, 1.0  ;;  %v1000_v31 = vmax.f32 %v984_v28, 1.0  ;;  %v1009_v33 = vmax.f32 %v993_v29, 1.0  ;;  %v994_v36 = vld [vmem:[#allocation3 + $0x68] sm:$0xff]  ;;  %v2195_v37 = vld [vmem:[#allocation13 + $0x38] sm:$0xff]  ;;  %v985_v38 = vld [vmem:[#allocation3 + $0x20] sm:$0xff] }
 0x25d   : > { %2410 = vrcp.f32 %v997_v16  ;;  %v2179_v39 = vld [vmem:[#allocation12 + $0x38] sm:$0xff]  ;;  %v986_v40 = vld [vmem:[#allocation3 + $0x28] sm:$0xff]  ;;  %1293 = vmatpush.bf16.msra.mxu0 %v2195_v37  ;;  %v2194_v41 = vld [vmem:[#allocation13 + $0x30] sm:$0xff]  ;;  %v1010_v42 = vmax.f32 %v994_v36, 1.0  ;;  %2213 = vmatpush.bf16.msra.mxu2 %v2195_v37  ;;  %v1001_v43 = vmax.f32 %v985_v38, 1.0 }
 0x25e   : > { %2412 = vrcp.f32 %v1007_v17  ;;  %1390 = vmatpush.bf16.msra.mxu1 %v2179_v39  ;;  %2221 = vmatpush.bf16.msra.mxu3 %v2179_v39  ;;  %v1002_v45 = vmax.f32 %v986_v40, 1.0  ;;  %v2193_v47 = vld [vmem:[#allocation13 + $0x28] sm:$0xff]  ;;  %v995_v49 = vld [vmem:[#allocation3 + $0x70] sm:$0xff]  ;;  %v996_v50 = vld [vmem:[#allocation3 + $0x78] sm:$0xff] }
 0x25f   : > { %2414 = vrcp.f32 %v1006_v21  ;;  %v987_v51 = vld [vmem:[#allocation3 + $0x30] sm:$0xff]  ;;  %v1011_v52 = vmax.f32 %v995_v49, 1.0  ;;  %v1012_v53 = vmax.f32 %v996_v50, 1.0  ;;  %v988_v58 = vld [vmem:[#allocation3 + $0x38] sm:$0xff]  ;;  %v2192_v0 = vld [vmem:[#allocation13 + $0x20] sm:$0xff] }
 0x260   : > { %2416 = vrcp.f32 %v998_v22  ;;  %v1003_v55 = vmax.f32 %v987_v51, 1.0  ;;  %v1004_v59 = vmax.f32 %v988_v58, 1.0  ;;  %v2178_v1 = vld [vmem:[#allocation12 + $0x30] sm:$0xff]  ;;  %v2191_v2 = vld [vmem:[#allocation13 + $0x18] sm:$0xff]  ;;  %v2177_v3 = vld [vmem:[#allocation12 + $0x28] sm:$0xff] }
 0x261   : > { %2418 = vrcp.f32 %v1008_v23  ;;  %1294 = vmatpush.bf16.msra.mxu0 %v2194_v41  ;;  %2214 = vmatpush.bf16.msra.mxu2 %v2194_v41  ;;  %v2190_v4 = vld [vmem:[#allocation13 + $0x10] sm:$0xff]  ;;  %v2176_v5 = vld [vmem:[#allocation12 + $0x20] sm:$0xff]  ;;  %v2189_v6 = vld [vmem:[#allocation13 + $0x8] sm:$0xff] }
 0x262   : > { %v2409_v24 = vpop.eup %2408  ;;  %2420 = vrcp.f32 %v999_v30  ;;  %1391 = vmatpush.bf16.msra.mxu1 %v2178_v1  ;;  %2222 = vmatpush.bf16.msra.mxu3 %v2178_v1  ;;  %v2175_v7 = vld [vmem:[#allocation12 + $0x18] sm:$0xff]  ;;  %v2188_v8 = vld [vmem:[#allocation13] sm:$0xff]  ;;  %v2174_v9 = vld [vmem:[#allocation12 + $0x10] sm:$0xff] }
 0x263   : > { %v2411_v25 = vpop.eup %2410  ;;  %1087 = vperm.xlu0 %2404, %v2409_v24   ;;  %2422 = vrcp.f32 %v1000_v31  ;;  %v2180_v10 = vld [vmem:[%s3136_s24] sm:$0xff]  ;;  %v2173_v11 = vld [vmem:[#allocation12 + $0x8] sm:$0xff]  ;;  %v2182_v18 = vld [vmem:[%s3136_s24 + $0x10] sm:$0xff] }
 0x264   : > { %v2413_v27 = vpop.eup %2412  ;;  %1047 = vperm.xlu1 %2405, %v2411_v25   ;;  %2424 = vrcp.f32 %v1009_v33  ;;  %v2184_v12 = vld [vmem:[%s3136_s24 + $0x20] sm:$0xff]  ;;  %v2181_v14 = vld [vmem:[%s3136_s24 + $0x8] sm:$0xff]  ;;  %v2186_v19 = vld [vmem:[%s3136_s24 + $0x30] sm:$0xff] }
 0x265   : > { %1097 = vperm.xlu2 %2406, %v2413_v27   ;;  %v2415_v32 = vpop.eup %2414  ;;  %2426 = vrcp.f32 %v1010_v42  ;;  %1295 = vmatpush.bf16.msra.mxu0 %v2193_v47  ;;  %v2172_v13 = vld [vmem:[#allocation12] sm:$0xff]  ;;  %v2185_v15 = vld [vmem:[%s3136_s24 + $0x28] sm:$0xff]  ;;  %v1013_v22 = vld [vmem:[#allocation2 + $0x30] sm:$0xff] }
 0x266   : > { %v2417_v34 = vpop.eup %2416  ;;  %2428 = vrcp.f32 %v1001_v43  ;;  %2215 = vmatpush.bf16.msra.mxu2 %v2193_v47  ;;  %1392 = vmatpush.bf16.msra.mxu1 %v2177_v3  ;;  %v1021_v20 = vld [vmem:[#allocation2 + $0x40] sm:$0xff]  ;;  %v2183_v33 = vld [vmem:[%s3136_s24 + $0x18] sm:$0xff]  ;;  %v1026_v50 = vld [vmem:[#allocation2 + $0x70] sm:$0xff] }
 0x267   : > { %v2419_v35 = vpop.eup %2418  ;;  %2430 = vrcp.f32 %v1002_v45  ;;  %2223 = vmatpush.bf16.msra.mxu3 %v2177_v3  ;;  %v1022_v21 = vld [vmem:[#allocation2 + $0x20] sm:$0xff]  ;;  %v1024_v36 = vld [vmem:[#allocation2 + $0x38] sm:$0xff]  ;;  %v1017_v51 = vld [vmem:[#allocation2 + $0x50] sm:$0xff] }
 0x268   : > { %v2421_v44 = vpop.eup %2420  ;;  %2432 = vrcp.f32 %v1011_v52  ;;  %v1014_v23 = vld [vmem:[#allocation2] sm:$0xff]  ;;  %v1015_v38 = vld [vmem:[#allocation2 + $0x58] sm:$0xff] }
 0x269   : > { %v2423_v46 = vpop.eup %2422  ;;  %2434 = vrcp.f32 %v1012_v53  ;;  %1296 = vmatpush.bf16.msra.mxu0 %v2192_v0  ;;  %v1016_v40 = vld [vmem:[#allocation2 + $0x18] sm:$0xff]  ;;  %v1025_v53 = vld [vmem:[#allocation2 + $0x60] sm:$0xff] }
 0x26a   : > { %v2425_v48 = vpop.eup %2424  ;;  %2436 = vrcp.f32 %v1003_v55  ;;  %2216 = vmatpush.bf16.msra.mxu2 %v2192_v0  ;;  %1393 = vmatpush.bf16.msra.mxu1 %v2176_v5  ;;  %v1028_v0 = vld [vmem:[#allocation2 + $0x28] sm:$0xff] }
 0x26b   : > { %1092 = vperm.xlu0 %2404, %v2415_v32   ;;  %v2427_v54 = vpop.eup %2426  ;;  %2438 = vrcp.f32 %v1004_v59  ;;  %2224 = vmatpush.bf16.msra.mxu3 %v2176_v5 }
 0x26c   : > { %1052 = vperm.xlu1 %2405, %v2417_v34   ;;  %v2429_v56 = vpop.eup %2428  ;;  %v2187_v34 = vld [vmem:[%s3136_s24 + $0x38] sm:$0xff] }
 0x26d   : > { %1102 = vperm.xlu2 %2406, %v2419_v35   ;;  %v2431_v57 = vpop.eup %2430  ;;  %1297 = vmatpush.bf16.msra.mxu0 %v2191_v2  ;;  %v1023_v35 = vld [vmem:[#allocation2 + $0x10] sm:$0xff] }
 0x26e   : > { %v2433_v60 = vpop.eup %2432  ;;  %2217 = vmatpush.bf16.msra.mxu2 %v2191_v2  ;;  %1394 = vmatpush.bf16.msra.mxu1 %v2175_v7  ;;  %v1020_v2 = vld [vmem:[#allocation2 + $0x48] sm:$0xff] }
 0x26f   : > { %v2435_v61 = vpop.eup %2434  ;;  %2225 = vmatpush.bf16.msra.mxu3 %v2175_v7 }
 0x270   : > { %v2437_v62 = vpop.eup %2436 }
 0x271   : > { %v2439_v63 = vpop.eup %2438  ;;  %1298 = vmatpush.bf16.msra.mxu0 %v2190_v4 }
 0x272   : > { %2218 = vmatpush.bf16.msra.mxu2 %v2190_v4  ;;  %1395 = vmatpush.bf16.msra.mxu1 %v2174_v9  ;;  %v1019_v4 = vld [vmem:[#allocation2 + $0x8] sm:$0xff] }
 0x273   : > { %1057 = vperm.xlu0 %2404, %v2421_v44   ;;  %2226 = vmatpush.bf16.msra.mxu3 %v2174_v9 }
 0x274   : > { %1062 = vperm.xlu1 %2405, %v2423_v46  }
 0x275   : > { %1107 = vperm.xlu2 %2406, %v2425_v48   ;;  %1299 = vmatpush.bf16.msra.mxu0 %v2189_v6 }
 0x276   : > { %2219 = vmatpush.bf16.msra.mxu2 %v2189_v6  ;;  %1396 = vmatpush.bf16.msra.mxu1 %v2173_v11 }
 0x277   : > { %2227 = vmatpush.bf16.msra.mxu3 %v2173_v11 }
 0x279   : > { %1300 = vmatpush.bf16.msra.mxu0 %v2188_v8 }
 0x27a   : > { %2220 = vmatpush.bf16.msra.mxu2 %v2188_v8  ;;  %1397 = vmatpush.bf16.msra.mxu1 %v2172_v13 }
 0x27b   : > { %1112 = vperm.xlu0 %2404, %v2427_v54   ;;  %2228 = vmatpush.bf16.msra.mxu3 %v2172_v13  ;;  %v1018_v54 = vld [vmem:[#allocation2 + $0x68] sm:$0xff] }
 0x27c   : > { %1067 = vperm.xlu1 %2405, %v2429_v56   ;;  %1301 = vmatmul.bf16.vlgmr.msra.gmra.mxu0 %v2180_v10 }
 0x27d   : > { %1072 = vperm.xlu2 %2406, %v2431_v57   ;;  %1321 = vmatmul.bf16.vlgmr.msra.gmra.mxu2 %v2184_v12 }
 0x283   : > { %1117 = vperm.xlu0 %2404, %v2433_v60  }
 0x284   : > { %1122 = vperm.xlu1 %2405, %v2435_v61  }
 0x285   : > { %1077 = vperm.xlu2 %2406, %v2437_v62  }
 0x28b   : > { %1082 = vperm.xlu0 %2404, %v2439_v63   ;;  %v1027_v63 = vld [vmem:[#allocation2 + $0x78] sm:$0xff] }
 0x28c   : > { %1306 = vmatmul.bf16.gmra.mxu0 %v2181_v14 }
 0x28d   : > { %1326 = vmatmul.bf16.gmra.mxu2 %v2185_v15  ;;  %v3226_v15 = vld [vmem:[%s3536_s20] ss:$0 sm:$0xff] }
 0x29c   : > { %1311 = vmatmul.bf16.gmra.mxu0 %v2182_v18 }
 0x29d   : > { %1331 = vmatmul.bf16.gmra.mxu2 %v2186_v19 }
 0x2ac   : > { %1316 = vmatmul.bf16.gmra.mxu0 %v2183_v33 }
 0x2ad   : > { %1336 = vmatmul.bf16.gmra.mxu2 %v2187_v34 }
 0x2bf   : > { %v1098_v28 = vpop.permute.xlu2 %1097 }
 0x2c0   : > { %v1135_v42 = vmul.f32 %v1098_v28, %v1023_v35 }
 0x2c7   : > { %v1103_v37 = vpop.permute.xlu2 %1102 }
 0x2c8   : > { %v1136_v43 = vmul.f32 %v1103_v37, %v1024_v36 }
 0x2ca   : > { %v1146_v46 = vpack.c.bf16 %v1136_v43, %v1135_v42 }
 0x2cf   : > { %v1108_v48 = vpop.permute.xlu2 %1107 }
 0x2d0   : > { %v1137_v57 = vmul.f32 %v1108_v48, %v1025_v53 }
 0x2d5   : > { %v1088_v16 = vpop.permute.xlu0 %1087 }
 0x2d6   : > { %v1048_v17 = vpop.permute.xlu1 %1047  ;;  %v1133_v25 = vmul.f32 %v1088_v16, %v1021_v20 }
 0x2d7   : > { %v1125_v29 = vmul.f32 %v1048_v17, %v1013_v22  ;;  %v1073_v58 = vpop.permute.xlu2 %1072 }
 0x2d8   : > { %v1130_v59 = vmul.f32 %v1073_v58, %v1018_v54 }
 0x2dd   : > { %v1093_v24 = vpop.permute.xlu0 %1092 }
 0x2de   : > { %v1134_v26 = vmul.f32 %v1093_v24, %v1022_v21  ;;  %v1053_v27 = vpop.permute.xlu1 %1052 }
 0x2df   : > { %v1126_v30 = vmul.f32 %v1053_v27, %v1014_v23  ;;  %v1078_v5 = vpop.permute.xlu2 %1077 }
 0x2e0   : > { %v1145_v31 = vpack.c.bf16 %v1134_v26, %v1133_v25  ;;  %v1131_v9 = vmul.f32 %v1078_v5, %v1019_v4 }
 0x2e1   : > { %v1141_v32 = vpack.c.bf16 %v1126_v30, %v1125_v29 }
 0x2e2   : > { %1418 = vmatmul.bf16.vlgmr.msra.gmra.mxu3 %v1145_v31 }
 0x2e3   : > { %1398 = vmatmul.bf16.vlgmr.msra.gmra.mxu1 %v1141_v32 }
 0x2e5   : > { %v1058_v39 = vpop.permute.xlu0 %1057 }
 0x2e6   : > { %v1063_v41 = vpop.permute.xlu1 %1062  ;;  %v1127_v44 = vmul.f32 %v1058_v39, %v1015_v38 }
 0x2e7   : > { %v1128_v45 = vmul.f32 %v1063_v41, %v1016_v40 }
 0x2e9   : > { %v1142_v47 = vpack.c.bf16 %v1128_v45, %v1127_v44 }
 0x2ed   : > { %v1113_v49 = vpop.permute.xlu0 %1112 }
 0x2ee   : > { %v1068_v52 = vpop.permute.xlu1 %1067  ;;  %v1138_v55 = vmul.f32 %v1113_v49, %v1026_v50 }
 0x2ef   : > { %v1129_v56 = vmul.f32 %v1068_v52, %v1017_v51 }
 0x2f0   : > { %v1147_v61 = vpack.c.bf16 %v1138_v55, %v1137_v57 }
 0x2f1   : > { %v1143_v62 = vpack.c.bf16 %v1130_v59, %v1129_v56 }
 0x2f2   : > { %1423 = vmatmul.bf16.gmra.mxu3 %v1146_v46 }
 0x2f3   : > { %1403 = vmatmul.bf16.gmra.mxu1 %v1142_v47 }
 0x2f5   : > { %v1118_v60 = vpop.permute.xlu0 %1117 }
 0x2f6   : > { %v1123_v1 = vpop.permute.xlu1 %1122  ;;  %v1139_v6 = vmul.f32 %v1118_v60, %v1027_v63 }
 0x2f7   : > { %v1140_v7 = vmul.f32 %v1123_v1, %v1028_v0 }
 0x2f9   : > { %v1148_v10 = vpack.c.bf16 %v1140_v7, %v1139_v6  ;;  %v1302_v12 = vpop.f32.mrf.mxu0 }
 0x2fd   : > { %v1083_v3 = vpop.permute.xlu0 %1082 }
 0x2fe   : > { %v1132_v8 = vmul.f32 %v1083_v3, %v1020_v2 }
 0x300   : > { %v1144_v11 = vpack.c.bf16 %v1132_v8, %v1131_v9  ;;  %v1322_v13 = vpop.f32.mrf.mxu2 }
 0x301   : > { %v1304_v14 = vpop.f32.mrf.mxu0 }
 0x302   : > { %1428 = vmatmul.bf16.gmra.mxu3 %v1147_v61 }
 0x303   : > { %1408 = vmatmul.bf16.gmra.mxu1 %v1143_v62 }
 0x308   : > { %v1324_v18 = vpop.f32.mrf.mxu2 }
 0x309   : > { %v1307_v23 = vpop.f32.mrf.mxu0 }
 0x310   : > { %v1327_v29 = vpop.f32.mrf.mxu2 }
 0x311   : > { %v1309_v36 = vpop.f32.mrf.mxu0 }
 0x312   : > { %1433 = vmatmul.bf16.gmra.mxu3 %v1148_v10 }
 0x313   : > { %1413 = vmatmul.bf16.gmra.mxu1 %v1144_v11 }
 0x318   : > { %v1329_v44 = vpop.f32.mrf.mxu2 }
 0x319   : > { %v1312_v51 = vpop.f32.mrf.mxu0 }
 0x320   : > { %v1332_v58 = vpop.f32.mrf.mxu2 }
 0x321   : > { %v1314_v1 = vpop.f32.mrf.mxu0 }
 0x328   : > { %v1334_v9 = vpop.f32.mrf.mxu2 }
 0x360   : > { %v1399_v16 = vpop.f32.mrf.mxu1 }
 0x361   : > { %v1400_v17 = vadd.f32 %v1399_v16, %v1302_v12 }
 0x363   : > { %v1443_v19 = vadd.f32 %v3226_v15, %v1400_v17  ;;  %v1317_v17 = vpop.f32.mrf.mxu0 }
 0x365   : > { %v3229_v20 = vmax.f32 %v1443_v19, 0.0  ;;  %v1419_v21 = vpop.f32.mrf.mxu3 }
 0x366   : > { %v1420_v22 = vadd.f32 %v1419_v21, %v1322_v13 }
 0x367   : > { %v1475_v24 = vmul.f32 %v3229_v20, %v3229_v20 }
 0x368   : > { %v1451_v25 = vadd.f32 %v3226_v15, %v1420_v22  ;;  %v1401_v26 = vpop.f32.mrf.mxu1  ;;  %v1337_v22 = vpop.f32.mrf.mxu2 }
 0x369   : > { %v1402_v27 = vadd.f32 %v1401_v26, %v1304_v14  ;;  %1491 = vadd.xlane.f32.xlu1 %v1475_v24 }
 0x36a   : > { %v3234_v28 = vmax.f32 %v1451_v25, 0.0 }
 0x36b   : > { %v1444_v30 = vadd.f32 %v3226_v15, %v1402_v27 }
 0x36c   : > { %v1483_v31 = vmul.f32 %v3234_v28, %v3234_v28 }
 0x36d   : > { %v1421_v32 = vpop.f32.mrf.mxu3  ;;  %v3239_v34 = vmax.f32 %v1444_v30, 0.0 }
 0x36e   : > { %v1422_v33 = vadd.f32 %v1421_v32, %v1324_v18  ;;  %1507 = vadd.xlane.f32.xlu2 %v1483_v31 }
 0x36f   : > { %v1476_v42 = vmul.f32 %v3239_v34, %v3239_v34 }
 0x370   : > { %v1452_v35 = vadd.f32 %v3226_v15, %v1422_v33  ;;  %v1404_v37 = vpop.f32.mrf.mxu1 }
 0x371   : > { %v1405_v38 = vadd.f32 %v1404_v37, %v1307_v23 }
 0x372   : > { %v3242_v39 = vmax.f32 %v1452_v35, 0.0 }
 0x373   : > { %v1445_v40 = vadd.f32 %v3226_v15, %v1405_v38  ;;  %v1339_v38 = vpop.f32.mrf.mxu2 }
 0x374   : > { %v1484_v41 = vmul.f32 %v3242_v39, %v3242_v39 }
 0x375   : > { %v1424_v43 = vpop.f32.mrf.mxu3  ;;  %v3249_v46 = vmax.f32 %v1445_v40, 0.0 }
 0x376   : > { %v1425_v45 = vadd.f32 %v1424_v43, %v1327_v29  ;;  %1509 = vadd.xlane.f32.xlu0 %v1484_v41  ;;  %1493 = vadd.xlane.f32.xlu2 %v1476_v42  ;;  %v1319_v29 = vpop.f32.mrf.mxu0 }
 0x377   : > { %v1477_v54 = vmul.f32 %v3249_v46, %v3249_v46 }
 0x378   : > { %v1453_v47 = vadd.f32 %v3226_v15, %v1425_v45  ;;  %v1406_v48 = vpop.f32.mrf.mxu1 }
 0x379   : > { %v1407_v49 = vadd.f32 %v1406_v48, %v1309_v36 }
 0x37a   : > { %v3252_v50 = vmax.f32 %v1453_v47, 0.0 }
 0x37b   : > { %v1446_v52 = vadd.f32 %v3226_v15, %v1407_v49 }
 0x37c   : > { %v1485_v53 = vmul.f32 %v3252_v50, %v3252_v50 }
 0x37d   : > { %v3259_v55 = vmax.f32 %v1446_v52, 0.0  ;;  %v1426_v56 = vpop.f32.mrf.mxu3 }
 0x37e   : > { %v1427_v57 = vadd.f32 %v1426_v56, %v1329_v44  ;;  %1511 = vadd.xlane.f32.xlu1 %v1485_v53  ;;  %1495 = vadd.xlane.f32.xlu0 %v1477_v54 }
 0x37f   : > { %v1478_v59 = vmul.f32 %v3259_v55, %v3259_v55 }
 0x380   : > { %v1454_v60 = vadd.f32 %v3226_v15, %v1427_v57  ;;  %v1409_v61 = vpop.f32.mrf.mxu1 }
 0x381   : > { %v1410_v62 = vadd.f32 %v1409_v61, %v1312_v51  ;;  %1497 = vadd.xlane.f32.xlu2 %v1478_v59 }
 0x382   : > { %v3264_v63 = vmax.f32 %v1454_v60, 0.0 }
 0x383   : > { %v1447_v0 = vadd.f32 %v3226_v15, %v1410_v62 }
 0x384   : > { %v1486_v5 = vmul.f32 %v3264_v63, %v3264_v63 }
 0x385   : > { %v3267_v2 = vmax.f32 %v1447_v0, 0.0  ;;  %v1429_v3 = vpop.f32.mrf.mxu3 }
 0x386   : > { %v1430_v4 = vadd.f32 %v1429_v3, %v1332_v58 }
 0x387   : > { %v1479_v6 = vmul.f32 %v3267_v2, %v3267_v2 }
 0x388   : > { %v1455_v7 = vadd.f32 %v3226_v15, %v1430_v4  ;;  %v1411_v8 = vpop.f32.mrf.mxu1 }
 0x389   : > { %v1412_v10 = vadd.f32 %v1411_v8, %v1314_v1  ;;  %1513 = vadd.xlane.f32.xlu2 %v1486_v5  ;;  %1499 = vadd.xlane.f32.xlu1 %v1479_v6 }
 0x38a   : > { %v3274_v11 = vmax.f32 %v1455_v7, 0.0 }
 0x38b   : > { %v1448_v12 = vadd.f32 %v3226_v15, %v1412_v10 }
 0x38c   : > { %v1487_v13 = vmul.f32 %v3274_v11, %v3274_v11 }
 0x38d   : > { %v3279_v14 = vmax.f32 %v1448_v12, 0.0  ;;  %v1431_v16 = vpop.f32.mrf.mxu3 }
 0x38e   : > { %1515 = vadd.xlane.f32.xlu0 %v1487_v13  ;;  %v1432_v35 = vadd.f32 %v1431_v16, %v1334_v9 }
 0x38f   : > { %v1480_v18 = vmul.f32 %v3279_v14, %v3279_v14 }
 0x390   : > { %v1414_v19 = vpop.f32.mrf.mxu1  ;;  %v1456_v43 = vadd.f32 %v3226_v15, %v1432_v35 }
 0x391   : > { %v1415_v21 = vadd.f32 %v1414_v19, %v1317_v17  ;;  %1501 = vadd.xlane.f32.xlu2 %v1480_v18 }
 0x392   : > { %v3302_v48 = vmax.f32 %v1456_v43, 0.0 }
 0x393   : > { %v1449_v23 = vadd.f32 %v3226_v15, %v1415_v21 }
 0x394   : > { %v1488_v51 = vmul.f32 %v3302_v48, %v3302_v48 }
 0x395   : > { %v3284_v24 = vmax.f32 %v1449_v23, 0.0  ;;  %v1434_v25 = vpop.f32.mrf.mxu3 }
 0x396   : > { %v1435_v26 = vadd.f32 %v1434_v25, %v1337_v22 }
 0x397   : > { %v1481_v27 = vmul.f32 %v3284_v24, %v3284_v24 }
 0x398   : > { %v1457_v30 = vadd.f32 %v3226_v15, %v1435_v26  ;;  %v1416_v31 = vpop.f32.mrf.mxu1 }
 0x399   : > { %v1417_v32 = vadd.f32 %v1416_v31, %v1319_v29  ;;  %1503 = vadd.xlane.f32.xlu0 %v1481_v27 }
 0x39a   : > { %v3289_v33 = vmax.f32 %v1457_v30, 0.0 }
 0x39b   : > { %v1450_v36 = vadd.f32 %v3226_v15, %v1417_v32 }
 0x39c   : > { %v1489_v37 = vmul.f32 %v3289_v33, %v3289_v33 }
 0x39d   : > { %v3294_v40 = vmax.f32 %v1450_v36, 0.0  ;;  %v1436_v41 = vpop.f32.mrf.mxu3 }
 0x39e   : > { %v1437_v42 = vadd.f32 %v1436_v41, %v1339_v38  ;;  %1519 = vadd.xlane.f32.xlu2 %v1489_v37 }
 0x39f   : > { %v1482_v44 = vmul.f32 %v3294_v40, %v3294_v40 }
 0x3a0   : > { %v1458_v45 = vadd.f32 %v3226_v15, %v1437_v42 }
 0x3a1   : > { %1505 = vadd.xlane.f32.xlu1 %v1482_v44 }
 0x3a2   : > { %v3300_v47 = vmax.f32 %v1458_v45, 0.0 }
 0x3a4   : > { %v1490_v49 = vmul.f32 %v3300_v47, %v3300_v47 }
 0x3a6   : > { %1521 = vadd.xlane.f32.xlu0 %v1490_v49 }
 0x3a9   : > { %1517 = vadd.xlane.f32.xlu1 %v1488_v51 }
 0x3dc   : > { %v1492_v52 = vpop.xlane.xlu1 %1491 }
 0x3dd   : > { %2440 = vrsqrt.f32 %v1492_v52  ;;  %vm1545_vm3 = vweird.f32 %v1492_v52  ;;  %vm1523_vm5 = vcmp.eq.f32.partialorder %v1492_v52, 0.0 }
 0x3e1   : > { %v1508_v53 = vpop.xlane.xlu2 %1507 }
 0x3e2   : > { %2442 = vrsqrt.f32 %v1508_v53  ;;  %vm1625_vm7 = vweird.f32 %v1508_v53  ;;  %vm1531_vm9 = vcmp.eq.f32.partialorder %v1508_v53, 0.0 }
 0x3e3   : > { %v2441_v54 = vpop.eup %2440 }
 0x3e4   : > { %v1540_v56 = vmul.f32 %v2441_v54, %v1492_v52  ;;  %vm1546_vm2 = vweird.f32 %v2441_v54 }
 0x3e5   : > { %vm1547_vm4 = vmor %vm1545_vm3, %vm1546_vm2 }
 0x3e6   : > { %v1541_v15 = vmul.f32 %v2441_v54, %v1540_v56 }
 0x3e8   : > { %v2443_v57 = vpop.eup %2442  ;;  %v1542_v58 = vmul.f32 0.5, %v1541_v15 }
 0x3e9   : > { %v1620_v59 = vmul.f32 %v2443_v57, %v1508_v53  ;;  %v1510_v60 = vpop.xlane.xlu0 %1509  ;;  %v3308_v61 = vpop.xlane.xlu2 %1493  ;;  %vm1626_vm6 = vweird.f32 %v2443_v57 }
 0x3ea   : > { %v1543_v62 = vsub.f32 1.5, %v1542_v58  ;;  %2444 = vrsqrt.f32 %v1510_v60  ;;  %vm1627_vm8 = vmor %vm1625_vm7, %vm1626_vm6  ;;  %vm1635_vm12 = vweird.f32 %v1510_v60  ;;  %vm1555_vm14 = vweird.f32 %v3308_v61 }
 0x3eb   : > { %v1621_v0 = vmul.f32 %v2443_v57, %v1620_v59  ;;  %2446 = vrsqrt.f32 %v3308_v61  ;;  %vm1532_vm15 = vcmp.eq.f32.partialorder %v1510_v60, 0.0  ;;  %vm1524_vm1 = vcmp.eq.f32.partialorder %v3308_v61, 0.0 }
 0x3ec   : > { %v1544_v1 = vmul.f32 %v2441_v54, %v1543_v62 }
 0x3ed   : > { %v1622_v3 = vmul.f32 0.5, %v1621_v0 }
 0x3ee   : > { %v1548_v4 = vsel %vm1547_vm4, %v2441_v54, %v1544_v1 }
 0x3ef   : > { %v1699_v5 = vsel %vm1523_vm5, 1.0, %v1548_v4  ;;  %v1623_v6 = vsub.f32 1.5, %v1622_v3 }
 0x3f0   : > { %v2445_v7 = vpop.eup %2444  ;;  %v1715_v8 = vmul.f32 %v1699_v5, %v3229_v20 }
 0x3f1   : > { %v2447_v9 = vpop.eup %2446  ;;  %v1624_v10 = vmul.f32 %v2443_v57, %v1623_v6  ;;  %v1630_v12 = vmul.f32 %v2445_v7, %v1510_v60  ;;  %v3312_v13 = vpop.xlane.xlu0 %1495  ;;  %vm1636_vm10 = vweird.f32 %v2445_v7 }
 0x3f2   : > { %v3314_v16 = vpop.xlane.xlu1 %1511  ;;  %1731 = vst [vmem:[%s3151_s0] sm:$0xff] %v1715_v8  ;;  %v1550_v17 = vmul.f32 %v2447_v9, %v3308_v61  ;;  %2448 = vrsqrt.f32 %v3312_v13  ;;  %vm1556_vm11 = vweird.f32 %v2447_v9  ;;  %vm1637_vm13 = vmor %vm1635_vm12, %vm1636_vm10  ;;  %vm1565_vm3 = vweird.f32 %v3312_v13 }
 0x3f3   : > { %v1628_v18 = vsel %vm1627_vm8, %v2443_v57, %v1624_v10  ;;  %v1631_v19 = vmul.f32 %v2445_v7, %v1630_v12  ;;  %2450 = vrsqrt.f32 %v3314_v16  ;;  %vm1557_vm0 = vmor %vm1555_vm14, %vm1556_vm11  ;;  %vm1525_vm7 = vcmp.eq.f32.partialorder %v3312_v13, 0.0 }
 0x3f4   : > { %v1707_v21 = vsel %vm1531_vm9, 1.0, %v1628_v18  ;;  %v1551_v20 = vmul.f32 %v2447_v9, %v1550_v17  ;;  %v3320_v22 = vpop.xlane.xlu2 %1497  ;;  %vm1645_vm8 = vweird.f32 %v3314_v16  ;;  %vm1533_vm11 = vcmp.eq.f32.partialorder %v3314_v16, 0.0 }
 0x3f5   : > { %v1723_v23 = vmul.f32 %v1707_v21, %v3234_v28  ;;  %v1632_v25 = vmul.f32 0.5, %v1631_v19  ;;  %2452 = vrsqrt.f32 %v3320_v22  ;;  %vm1575_vm10 = vweird.f32 %v3320_v22 }
 0x3f6   : > { %v1552_v26 = vmul.f32 0.5, %v1551_v20 }
 0x3f7   : > { %1739 = vst [vmem:[%s3151_s0 + $0x40] sm:$0xff] %v1723_v23  ;;  %v1633_v27 = vsub.f32 1.5, %v1632_v25 }
 0x3f8   : > { %v2449_v29 = vpop.eup %2448  ;;  %v1553_v30 = vsub.f32 1.5, %v1552_v26 }
 0x3f9   : > { %v1634_v31 = vmul.f32 %v2445_v7, %v1633_v27  ;;  %v1560_v32 = vmul.f32 %v2449_v29, %v3312_v13  ;;  %v2451_v35 = vpop.eup %2450  ;;  %vm1566_vm2 = vweird.f32 %v2449_v29 }
 0x3fa   : > { %v1554_v36 = vmul.f32 %v2447_v9, %v1553_v30  ;;  %v1640_v41 = vmul.f32 %v2451_v35, %v3314_v16  ;;  %vm1646_vm4 = vweird.f32 %v2451_v35  ;;  %vm1567_vm5 = vmor %vm1565_vm3, %vm1566_vm2 }
 0x3fb   : > { %v2453_v28 = vpop.eup %2452  ;;  %v1638_v37 = vsel %vm1637_vm13, %v2445_v7, %v1634_v31  ;;  %v1561_v38 = vmul.f32 %v2449_v29, %v1560_v32  ;;  %vm1647_vm9 = vmor %vm1645_vm8, %vm1646_vm4  ;;  %vm1526_vm13 = vcmp.eq.f32.partialorder %v3320_v22, 0.0 }
 0x3fc   : > { %v1708_v42 = vsel %vm1532_vm15, 1.0, %v1638_v37  ;;  %v1558_v43 = vsel %vm1557_vm0, %v2447_v9, %v1554_v36  ;;  %v1570_v44 = vmul.f32 %v2453_v28, %v3320_v22  ;;  %v3330_v45 = vpop.xlane.xlu2 %1513  ;;  %v1641_v53 = vmul.f32 %v2451_v35, %v1640_v41  ;;  %v3333_v54 = vpop.xlane.xlu1 %1499 }
 0x3fd   : > { %v1724_v49 = vmul.f32 %v1708_v42, %v3242_v39  ;;  %v1700_v51 = vsel %vm1524_vm1, 1.0, %v1558_v43  ;;  %v1562_v52 = vmul.f32 0.5, %v1561_v38  ;;  %2454 = vrsqrt.f32 %v3330_v45 }
 0x3fe   : > { %v1716_v56 = vmul.f32 %v1700_v51, %v3239_v34  ;;  %v1571_v15 = vmul.f32 %v2453_v28, %v1570_v44  ;;  %v1642_v58 = vmul.f32 0.5, %v1641_v53  ;;  %2456 = vrsqrt.f32 %v3333_v54 }
 0x3ff   : > { %1740 = vst [vmem:[%s3151_s0 + $0x48] sm:$0xff] %v1724_v49  ;;  %v1563_v57 = vsub.f32 1.5, %v1562_v52  ;;  %vm1576_vm6 = vweird.f32 %v2453_v28  ;;  %vm1655_vm15 = vweird.f32 %v3330_v45  ;;  %vm1534_vm1 = vcmp.eq.f32.partialorder %v3330_v45, 0.0 }
 0x400   : > { %1732 = vst [vmem:[%s3151_s0 + $0x8] sm:$0xff] %v1716_v56  ;;  %v1572_v59 = vmul.f32 0.5, %v1571_v15  ;;  %v1643_v39 = vsub.f32 1.5, %v1642_v58  ;;  %vm1577_vm12 = vmor %vm1575_vm10, %vm1576_vm6  ;;  %vm1585_vm3 = vweird.f32 %v3333_v54 }
 0x401   : > { %v1564_v60 = vmul.f32 %v2449_v29, %v1563_v57  ;;  %v3341_v61 = vpop.xlane.xlu0 %1515 }
 0x402   : > { %v1573_v34 = vsub.f32 1.5, %v1572_v59  ;;  %2458 = vrsqrt.f32 %v3341_v61  ;;  %v1644_v0 = vmul.f32 %v2451_v35, %v1643_v39  ;;  %vm1535_vm8 = vcmp.eq.f32.partialorder %v3341_v61, 0.0 }
 0x403   : > { %v1568_v62 = vsel %vm1567_vm5, %v2449_v29, %v1564_v60  ;;  %v2455_v1 = vpop.eup %2454  ;;  %vm1527_vm5 = vcmp.eq.f32.partialorder %v3333_v54, 0.0 }
 0x404   : > { %v1701_v3 = vsel %vm1525_vm7, 1.0, %v1568_v62  ;;  %v1574_v4 = vmul.f32 %v2453_v28, %v1573_v34  ;;  %v3347_v5 = vpop.xlane.xlu2 %1501  ;;  %v1648_v7 = vsel %vm1647_vm9, %v2451_v35, %v1644_v0  ;;  %v1650_v8 = vmul.f32 %v2455_v1, %v3330_v45  ;;  %v2457_v9 = vpop.eup %2456 }
 0x405   : > { %v1717_v6 = vmul.f32 %v1701_v3, %v3249_v46  ;;  %v1709_v10 = vsel %vm1533_vm11, 1.0, %v1648_v7  ;;  %2460 = vrsqrt.f32 %v3347_v5  ;;  %v1580_v16 = vmul.f32 %v2457_v9, %v3333_v54 }
 0x406   : > { %v1578_v12 = vsel %vm1577_vm12, %v2453_v28, %v1574_v4  ;;  %v1725_v13 = vmul.f32 %v1709_v10, %v3252_v50  ;;  %v1651_v17 = vmul.f32 %v2455_v1, %v1650_v8  ;;  %vm1656_vm14 = vweird.f32 %v2455_v1 }
 0x407   : > { %1733 = vst [vmem:[%s3151_s0 + $0x10] sm:$0xff] %v1717_v6  ;;  %v1702_v46 = vsel %vm1526_vm13, 1.0, %v1578_v12  ;;  %v1581_v20 = vmul.f32 %v2457_v9, %v1580_v16  ;;  %vm1586_vm0 = vweird.f32 %v2457_v9  ;;  %vm1657_vm2 = vmor %vm1655_vm15, %vm1656_vm14  ;;  %vm1665_vm7 = vweird.f32 %v3341_v61 }
 0x408   : > { %v2459_v18 = vpop.eup %2458  ;;  %v1718_v19 = vmul.f32 %v1702_v46, %v3259_v55  ;;  %1741 = vst [vmem:[%s3151_s0 + $0x50] sm:$0xff] %v1725_v13  ;;  %v1652_v21 = vmul.f32 0.5, %v1651_v17  ;;  %vm1587_vm6 = vmor %vm1585_vm3, %vm1586_vm0  ;;  %vm1595_vm11 = vweird.f32 %v3347_v5  ;;  %vm1528_vm13 = vcmp.eq.f32.partialorder %v3347_v5, 0.0 }
 0x409   : > { %v1660_v23 = vmul.f32 %v2459_v18, %v3341_v61  ;;  %v1582_v25 = vmul.f32 0.5, %v1581_v20  ;;  %vm1666_vm4 = vweird.f32 %v2459_v18 }
 0x40a   : > { %1734 = vst [vmem:[%s3151_s0 + $0x18] sm:$0xff] %v1718_v19  ;;  %v1653_v22 = vsub.f32 1.5, %v1652_v21  ;;  %vm1667_vm9 = vmor %vm1665_vm7, %vm1666_vm4 }
 0x40b   : > { %v1661_v26 = vmul.f32 %v2459_v18, %v1660_v23  ;;  %v2461_v27 = vpop.eup %2460  ;;  %v1583_v30 = vsub.f32 1.5, %v1582_v25 }
 0x40c   : > { %v3363_v50 = vpop.xlane.xlu0 %1503  ;;  %v1654_v29 = vmul.f32 %v2455_v1, %v1653_v22  ;;  %v1590_v55 = vmul.f32 %v2461_v27, %v3347_v5  ;;  %vm1596_vm10 = vweird.f32 %v2461_v27 }
 0x40d   : > { %v1662_v31 = vmul.f32 0.5, %v1661_v26  ;;  %2462 = vrsqrt.f32 %v3363_v50  ;;  %v1584_v35 = vmul.f32 %v2457_v9, %v1583_v30  ;;  %vm1597_vm12 = vmor %vm1595_vm11, %vm1596_vm10  ;;  %vm1605_vm15 = vweird.f32 %v3363_v50 }
 0x40e   : > { %v1658_v32 = vsel %vm1657_vm2, %v2455_v1, %v1654_v29  ;;  %v1591_v28 = vmul.f32 %v2461_v27, %v1590_v55  ;;  %vm1529_vm0 = vcmp.eq.f32.partialorder %v3363_v50, 0.0 }
 0x40f   : > { %v1663_v36 = vsub.f32 1.5, %v1662_v31  ;;  %v1710_v37 = vsel %vm1534_vm1, 1.0, %v1658_v32  ;;  %v1588_v41 = vsel %vm1587_vm6, %v2457_v9, %v1584_v35 }
 0x410   : > { %v1726_v38 = vmul.f32 %v1710_v37, %v3264_v63  ;;  %v1592_v43 = vmul.f32 0.5, %v1591_v28  ;;  %v1703_v45 = vsel %vm1527_vm5, 1.0, %v1588_v41 }
 0x411   : > { %v1664_v42 = vmul.f32 %v2459_v18, %v1663_v36  ;;  %v3373_v44 = vpop.xlane.xlu2 %1519  ;;  %v1719_v49 = vmul.f32 %v1703_v45, %v3267_v2 }
 0x412   : > { %2464 = vrsqrt.f32 %v3373_v44  ;;  %1742 = vst [vmem:[%s3151_s0 + $0x58] sm:$0xff] %v1726_v38  ;;  %v1593_v52 = vsub.f32 1.5, %v1592_v43  ;;  %vm1685_vm3 = vweird.f32 %v3373_v44  ;;  %vm1537_vm4 = vcmp.eq.f32.partialorder %v3373_v44, 0.0 }
 0x413   : > { %v1668_v51 = vsel %vm1667_vm9, %v2459_v18, %v1664_v42  ;;  %v2463_v63 = vpop.eup %2462  ;;  %1735 = vst [vmem:[%s3151_s0 + $0x20] sm:$0xff] %v1719_v49 }
 0x414   : > { %v1711_v53 = vsel %vm1535_vm8, 1.0, %v1668_v51  ;;  %v3380_v54 = vpop.xlane.xlu1 %1505  ;;  %v1594_v15 = vmul.f32 %v2461_v27, %v1593_v52  ;;  %v1600_v57 = vmul.f32 %v2463_v63, %v3363_v50  ;;  %vm1606_vm14 = vweird.f32 %v2463_v63 }
 0x415   : > { %v1727_v56 = vmul.f32 %v1711_v53, %v3274_v11  ;;  %2466 = vrsqrt.f32 %v3380_v54  ;;  %vm1607_vm1 = vmor %vm1605_vm15, %vm1606_vm14  ;;  %vm1615_vm7 = vweird.f32 %v3380_v54  ;;  %vm1530_vm8 = vcmp.eq.f32.partialorder %v3380_v54, 0.0 }
 0x416   : > { %v1598_v2 = vsel %vm1597_vm12, %v2461_v27, %v1594_v15  ;;  %v1601_v58 = vmul.f32 %v2463_v63, %v1600_v57 }
 0x417   : > { %1743 = vst [vmem:[%s3151_s0 + $0x60] sm:$0xff] %v1727_v56  ;;  %v1704_v60 = vsel %vm1528_vm13, 1.0, %v1598_v2 }
 0x418   : > { %v2465_v59 = vpop.eup %2464  ;;  %v1720_v39 = vmul.f32 %v1704_v60, %v3279_v14  ;;  %v1602_v61 = vmul.f32 0.5, %v1601_v58 }
 0x419   : > { %v1680_v11 = vmul.f32 %v2465_v59, %v3373_v44  ;;  %v1522_v34 = vpop.xlane.xlu0 %1521  ;;  %vm1686_vm2 = vweird.f32 %v2465_v59 }
 0x41a   : > { %2468 = vrsqrt.f32 %v1522_v34  ;;  %1736 = vst [vmem:[%s3151_s0 + $0x28] sm:$0xff] %v1720_v39  ;;  %v1603_v62 = vsub.f32 1.5, %v1602_v61  ;;  %vm1687_vm5 = vmor %vm1685_vm3, %vm1686_vm2  ;;  %vm1695_vm11 = vweird.f32 %v1522_v34  ;;  %vm1538_vm13 = vcmp.eq.f32.partialorder %v1522_v34, 0.0 }
 0x41b   : > { %v1681_v0 = vmul.f32 %v2465_v59, %v1680_v11  ;;  %v2467_v1 = vpop.eup %2466 }
 0x41c   : > { %v1518_v3 = vpop.xlane.xlu1 %1517  ;;  %v1604_v4 = vmul.f32 %v2463_v63, %v1603_v62  ;;  %v1610_v6 = vmul.f32 %v2467_v1, %v3380_v54  ;;  %vm1616_vm6 = vweird.f32 %v2467_v1 }
 0x41d   : > { %v1682_v5 = vmul.f32 0.5, %v1681_v0  ;;  %2470 = vrsqrt.f32 %v1518_v3  ;;  %vm1617_vm9 = vmor %vm1615_vm7, %vm1616_vm6  ;;  %vm1675_vm15 = vweird.f32 %v1518_v3 }
 0x41e   : > { %v1608_v14 = vsel %vm1607_vm1, %v2463_v63, %v1604_v4  ;;  %v1611_v8 = vmul.f32 %v2467_v1, %v1610_v6  ;;  %vm1536_vm1 = vcmp.eq.f32.partialorder %v1518_v3, 0.0 }
 0x41f   : > { %v1683_v7 = vsub.f32 1.5, %v1682_v5  ;;  %v1705_v10 = vsel %vm1529_vm0, 1.0, %v1608_v14 }
 0x420   : > { %v2469_v9 = vpop.eup %2468  ;;  %v1721_v12 = vmul.f32 %v1705_v10, %v3284_v24  ;;  %v1612_v46 = vmul.f32 0.5, %v1611_v8 }
 0x421   : > { %v1684_v13 = vmul.f32 %v2465_v59, %v1683_v7  ;;  %v1690_v17 = vmul.f32 %v2469_v9, %v1522_v34  ;;  %vm1696_vm10 = vweird.f32 %v2469_v9 }
 0x422   : > { %1737 = vst [vmem:[%s3151_s0 + $0x30] sm:$0xff] %v1721_v12  ;;  %v1613_v18 = vsub.f32 1.5, %v1612_v46  ;;  %vm1697_vm12 = vmor %vm1695_vm11, %vm1696_vm10 }
 0x423   : > { %v1688_v16 = vsel %vm1687_vm5, %v2465_v59, %v1684_v13  ;;  %v1691_v19 = vmul.f32 %v2469_v9, %v1690_v17  ;;  %v2471_v21 = vpop.eup %2470 }
 0x424   : > { %v1713_v20 = vsel %vm1537_vm4, 1.0, %v1688_v16  ;;  %v1614_v22 = vmul.f32 %v2467_v1, %v1613_v18  ;;  %v1670_v25 = vmul.f32 %v2471_v21, %v1518_v3  ;;  %vm1676_vm14 = vweird.f32 %v2471_v21 }
 0x425   : > { %v1729_v23 = vmul.f32 %v1713_v20, %v3289_v33  ;;  %v1692_v24 = vmul.f32 0.5, %v1691_v19  ;;  %vm1677_vm0 = vmor %vm1675_vm15, %vm1676_vm14 }
 0x426   : > { %v1618_v26 = vsel %vm1617_vm9, %v2467_v1, %v1614_v22  ;;  %v1671_v50 = vmul.f32 %v2471_v21, %v1670_v25 }
 0x427   : > { %1745 = vst [vmem:[%s3151_s0 + $0x70] sm:$0xff] %v1729_v23  ;;  %v1693_v27 = vsub.f32 1.5, %v1692_v24  ;;  %v1706_v29 = vsel %vm1530_vm8, 1.0, %v1618_v26 }
 0x428   : > { %v1722_v30 = vmul.f32 %v1706_v29, %v3294_v40  ;;  %v1672_v55 = vmul.f32 0.5, %v1671_v50 }
 0x429   : > { %v1694_v31 = vmul.f32 %v2469_v9, %v1693_v27 }
 0x42a   : > { %1738 = vst [vmem:[%s3151_s0 + $0x38] sm:$0xff] %v1722_v30  ;;  %v1673_v32 = vsub.f32 1.5, %v1672_v55 }
 0x42b   : > { %v1698_v33 = vsel %vm1697_vm12, %v2469_v9, %v1694_v31 }
 0x42c   : > { %v1714_v35 = vsel %vm1538_vm13, 1.0, %v1698_v33  ;;  %v1674_v28 = vmul.f32 %v2471_v21, %v1673_v32 }
 0x42d   : > { %v1730_v36 = vmul.f32 %v1714_v35, %v3300_v47 }
 0x42e   : > { %v1678_v37 = vsel %vm1677_vm0, %v2471_v21, %v1674_v28 }
 0x42f   : > { %1746 = vst [vmem:[%s3151_s0 + $0x78] sm:$0xff] %v1730_v36  ;;  %v1712_v40 = vsel %vm1536_vm1, 1.0, %v1678_v37 }
 0x430   : > { %v1728_v38 = vmul.f32 %v1712_v40, %v3302_v48 }
 0x432   : > { %1744 = vst [vmem:[%s3151_s0 + $0x68] sm:$0xff] %v1728_v38 }
 0x433 PF: > { %s3537_s6 = sld [smem:[#allocation24_spill]]  ;;  %s1760_s24 = sshll.u32 %s3151_s0, 4  ;;  %s1761_s24 = int_to_ptr.vmem [resolvable:$true] %s1760_s24 }
 0x434   : > { %s3538_s14 = sld [smem:[#allocation38_spill]]  ;;  %s1748_s26 = scalar_lea.sflag [#allocation6], %s3133_s17 }
 0x439   : > { %s2196_s11 = sshll.u32 %s3537_s6, 7 }
 0x43a   : > { %s3539_s7 = smov %s3538_s14  ;;  %s1759_s2 = scalar_lea.hbm %s3538_s14, %s2196_s11 }
 0x43b   : > { %s1762_s21 = sshll.u32 %s1759_s2, 4  ;;  %s2672_s15 = scalar_lea.hbm %s3539_s7, 256  ;;  %s1763_s21 = int_to_ptr.hbm [resolvable:$true] %s1762_s21 }
 0x43c   : > { %s2666_s19 = sshra.s32 %s1763_s21, 4  ;;  %s2667_s19 = int_to_ptr.hbm [resolvable:$true] %s2666_s19 }
 0x43d   : > { %s2668_s3 = scalar_lea.hbm %s2667_s19, 128  ;;  %p2673_p13 = scmp.lt.s32.totalorder %s2667_s19, %s3539_s7 }
 0x43e   : > { %p2669_p8 = scmp.ne.s32.totalorder %s2667_s19, %s2668_s3  ;;  %p2674_p7 = scmp.lt.s32.totalorder %s2672_s15, %s2668_s3 }
 0x440   : > { %p2670_p0 = pnand %p2669_p8, %p3097_p6  ;;  %p2675_p9 = por %p2674_p7, %p2673_p13 }
 0x442   : > { %p2671_p3 = pneg %p2670_p0 }
 0x444   : > { %p2676_p10 = pnand %p2675_p9, %p2671_p3 }
 0x446   : > { %2679 = shalt.err (!%p2676_p10)
}
 0x447   : > { %s2824_s17 = smov 128   ;;  %s2825_s0 = smov 8  }
 0x448   : > { %2247 = dma.vmem_to_hbm [thread:$0]  (%p3097_p6), %s1761_s24, 2048, %s1763_s21, %s1748_s26, %s2824_s17, %s2824_s17, %s2825_s0  }
 0x449 PF: > { %p2280_p12 = scmp.ge.s32.totalorder %s2814_s18, 2  ;;  %s1777_s6 = sand.u32 1, %s2762_s27  }
 0x44a   : > { %s1778_s11 = scalar_lea.sflag [#allocation6], %s1777_s6 }
 0x44b   : > { %p2270_p11 = pnand %p2280_p12, %p3101_p5 }
 0x44d   : > { %p2271_p2 = pneg %p2270_p11 }
 0x44f   : > { %2757 = dma.done.wait (%p2271_p2), %s1778_s11, 2048  }
 0x450   : > { %2759 = vsyncadd (%p2271_p2), %s1778_s11, 4294965248  ;;  %s29_s18 = sadd.s32 1, %s2814_s18   ;;  %s3541_s1 = sld [smem:[#allocation22_spill]] }
 0x451   : > { %p3430_p4 = scmp.ge.s32.totalorder %s29_s18, 6   ;;  %s3542_s14 = sld [smem:[#allocation29_spill]] }
 0x452   : > { %s3543_s15 = sld [smem:[#allocation25_spill]]  ;;  %s3546_s27 = smov %s2766_s28 }
 0x453   : > { %s3544_s5 = sld [smem:[#allocation27_spill]]  ;;  %s3547_s28 = smov %s2770_s29 }
 0x454   : > { %s3545_s17 = sld [smem:[#allocation28_spill]]  ;;  %s3548_s29 = smov %s3080_s30 }
 0x455   : > { %s3550_s9 = smov %s2782_s10  ;;  %s3552_s11 = smov %s2790_s12 }
 0x456   : > { %s3549_s30 = smov %s3541_s1  ;;  %s3553_s12 = smov %s2794_s13 }
 0x457   : > { %s3551_s10 = smov %s3542_s14  ;;  %s3554_s13 = smov %s3047_s23 }
 0x458   : > { %s3555_s14 = smov %s2806_s16  ;;  %28 = sbr.rel (!%p3430_p4) target bundleno = 24 (0x18), region = 141 }
 0x459   : > { %s3556_s16 = smov %s3544_s5 }
 0x45d   :  { %1784 = vsyncpa [#allocation5], 1 }
 0x45e   :  { %1786 = vsyncpa [#allocation5 + $0x1], 1 }
 0x45f   :  { %1787 = vsyncpa [#allocation8], 1 }
 0x460   :  { %1789 = vsyncpa [#allocation8 + $0x1], 1 }
 0x461   :  { %1790 = vsyncpa [#allocation11], 1 }
 0x462   :  { %1791 = vsyncpa [#allocation14], 1 }
 0x463   :  { %1792 = vsyncpa [#allocation6], 1 }
 0x464   :  { %1794 = vsyncpa [#allocation6 + $0x1], 1 }

</bundles_post_ra>
